<compile_context>
chip_gen: v5e
topology: v5e:2x2
jax: 0.10.0
libtpu: 0.0.40
codegen_flags: <defaults>
</compile_context>

<pallas_src>
import jax
import jax.numpy as jnp
from jax import lax
from jax.experimental import pallas as pl
from jax.experimental.pallas import tpu as pltpu


# ----------------------------------------------------------------------------
# Fused Pallas kernel: emb = relu(...relu(relu(x@W1+b1)@W2+b2)...@Wfc+bfc)
# refs = (x_ref, w1, b1, w2, b2, w3, b3, w4, b4, wfc, bfc, o_ref)
# ----------------------------------------------------------------------------
def _fused_encoder_kernel(*refs):
    x_ref, o_ref = refs[0], refs[-1]
    wb_refs = refs[1:-1]
    n_layers = len(wb_refs) // 2
    cdt = wb_refs[0].dtype                      # compute dtype (bf16 or f32)
    a = x_ref[...].astype(cdt)                  # (TB, K0)
    for li in range(n_layers):
        w_ref = wb_refs[2 * li]                 # (K_l, N_l)
        b_ref = wb_refs[2 * li + 1]             # (1, N_l) f32
        acc = jnp.dot(a, w_ref[...], preferred_element_type=jnp.float32)
        act = jnp.maximum(acc + b_ref[...], 0.0)           # f32 bias + ReLU
        a = act if li == n_layers - 1 else act.astype(cdt)
    o_ref[...] = a.astype(o_ref.dtype)


_TB_MAX = 256  # batch tile cap: keeps per-step VMEM < ~8 MiB with bf16 weights


def _pick_batch_tile(b):
    if b <= 16:
        return b                        # single step; full-dim block is legal
    tb = min(_TB_MAX, -(-b // 2))       # >=2 grid steps -> megacore on v7x
    return -(-tb // 8) * 8              # sublane dim multiple of 8


def fused_encoder(x_flat, mats, biases):
    """x_flat: (B, K0); mats[l]: (K_l, N_l); biases[l]: (1, N_l) -> (B, N_last) f32."""
    b, k0 = x_flat.shape
    e = mats[-1].shape[1]
    tb = _pick_batch_tile(b)

    in_specs = [pl.BlockSpec((tb, k0), lambda i: (i, 0))]          # streamed
    operands = [x_flat]
    for w, bias in zip(mats, biases):
        in_specs.append(pl.BlockSpec(w.shape, lambda i: (0, 0)))    # resident
        in_specs.append(pl.BlockSpec(bias.shape, lambda i: (0, 0)))  # resident
        operands += [w, bias]

    return pl.pallas_call(
        _fused_encoder_kernel,
        out_shape=jax.ShapeDtypeStruct((b, e), jnp.float32),
        grid=(pl.cdiv(b, tb),),
        in_specs=in_specs,
        out_specs=pl.BlockSpec((tb, e), lambda i: (i, 0)),
        compiler_params=pltpu.CompilerParams(
            dimension_semantics=("parallel",),
            vmem_limit_bytes=32 * 1024 * 1024,
        ),
    )(*operands)


@jax.jit
def _encode_jit(x_flat, mats, biases):
    return fused_encoder(x_flat, mats, biases)


# ----------------------------------------------------------------------------
# Parameters
# ----------------------------------------------------------------------------
class Config:
    units = 32
    encoder_output_dimension = 32


def _conv_out_hw(h, w, n_layers=4, k=4, stride=2, pad=1):
    for _ in range(n_layers):
        h = (h + 2 * pad - k) // stride + 1
        w = (w + 2 * pad - k) // stride + 1
    return h, w


def init_torch_params(key, input_shape, cfg):
    """Parameters in the PyTorch module's native layout (reference / export)."""
    h, w, c = input_shape
    u = cfg.units
    chans = [c, u // 4, u // 2, u, u * 2]
    params = {"conv": []}
    for li in range(4):
        key, kw_, kb_ = jax.random.split(key, 3)
        cin, cout = chans[li], chans[li + 1]
        scale = (cin * 16) ** -0.5
        wt = jax.random.normal(kw_, (cout, cin, 4, 4), jnp.float32) * scale
        bt = jax.random.normal(kb_, (cout,), jnp.float32) * scale
        params["conv"].append((wt, bt))
    oh, ow = _conv_out_hw(h, w)
    conv_out = chans[-1] * oh * ow
    key, kw_, kb_ = jax.random.split(key, 3)
    scale = conv_out ** -0.5
    params["fc_w"] = jax.random.normal(
        kw_, (cfg.encoder_output_dimension, conv_out), jnp.float32) * scale
    params["fc_b"] = jax.random.normal(
        kb_, (cfg.encoder_output_dimension,), jnp.float32) * scale
    return params


def _unrolled_conv_matrix(wt, hin, win, stride=2, pad=1):
    """Fold a conv into a dense right-multiplier: (Cin*Hin*Win, Cout*OH*OW)."""
    cout, cin, _, _ = wt.shape
    k_in = cin * hin * win
    basis = jnp.eye(k_in, dtype=jnp.float32).reshape(k_in, cin, hin, win)
    y = lax.conv_general_dilated(
        basis, jnp.asarray(wt, jnp.float32),
        window_strides=(stride, stride), padding=((pad, pad), (pad, pad)),
        dimension_numbers=("NCHW", "OIHW", "NCHW"),
        precision=lax.Precision.HIGHEST)
    oh, ow = y.shape[2], y.shape[3]
    return y.reshape(k_in, cout * oh * ow), oh, ow


def prepare_params(torch_params, input_shape, compute_dtype=jnp.bfloat16):
    """One-time conversion to the fused-kernel layout (done at init, not per step)."""
    h, w, c = int(input_shape[0]), int(input_shape[1]), int(input_shape[2])
    mats, biases = [], []
    hin, win = h, w
    for (wt, bt) in torch_params["conv"]:
        m, oh, ow = _unrolled_conv_matrix(wt, hin, win)
        mats.append(m.astype(compute_dtype))
        biases.append(jnp.repeat(jnp.asarray(bt, jnp.float32), oh * ow).reshape(1, -1))
        hin, win = oh, ow
    # FC: rows of the (c,h,w)-ordered conv output already match PyTorch's NCHW
    # flatten, so the weight is used as-is (transposed for A @ W orientation).
    mats.append(jnp.asarray(torch_params["fc_w"], jnp.float32).T.astype(compute_dtype))
    biases.append(jnp.asarray(torch_params["fc_b"], jnp.float32).reshape(1, -1))
    # First-layer matrix with rows permuted to NHWC flatten order: channels-last
    # observations then need only a reshape (no transpose) before the kernel.
    n1 = mats[0].shape[1]
    w1_cl = mats[0].reshape(c, h, w, n1).transpose(1, 2, 0, 3).reshape(h * w * c, n1)
    return {
        "mats": mats, "biases": biases, "w1_channels_last": w1_cl,
        "channels": c, "height": h, "width": w, "compute_dtype": compute_dtype,
    }


# ----------------------------------------------------------------------------
# Forward
# ----------------------------------------------------------------------------
def multi_encoder_forward(params, observations, channels_last=None):
    x = observations["image"]
    bt = None
    if x.ndim == 5:                                  # (B, T, ...): fold B*T
        bt = x.shape[:2]
        x = x.reshape((x.shape[0] * x.shape[1],) + x.shape[2:])
    if channels_last is None:
        # mirrors the PyTorch module's check; pass channels_last explicitly
        # in production if W could collide with the channel count.
        channels_last = (x.shape[-1] == params["channels"])
    cdt = params["compute_dtype"]
    mats = list(params["mats"])
    if channels_last:
        mats[0] = params["w1_channels_last"]         # rows in (h, w, c) order
    x_flat = x.reshape(x.shape[0], -1).astype(cdt)   # lane-dense (B, H*W*C)
    emb = _encode_jit(x_flat, tuple(mats), tuple(params["biases"]))
    if bt is not None:
        emb = emb.reshape(bt + (emb.shape[-1],))
    return emb


# ----------------------------------------------------------------------------
# Plain-XLA reference of the PyTorch module (for numerical validation)
# ----------------------------------------------------------------------------
def reference_forward(torch_params, observations, channels):
    x = observations["image"]
    bt = None
    if x.ndim == 5:
        bt = x.shape[:2]
        x = x.reshape((x.shape[0] * x.shape[1],) + x.shape[2:])
    x = x.astype(jnp.float32)
    if x.shape[-1] == channels:
        x = jnp.transpose(x, (0, 3, 1, 2))           # NHWC -> NCHW
    for (wt, bias) in torch_params["conv"]:
        x = lax.conv_general_dilated(
            x, wt, window_strides=(2, 2), padding=((1, 1), (1, 1)),
            dimension_numbers=("NCHW", "OIHW", "NCHW"),
            precision=lax.Precision.HIGHEST)
        x = jnp.maximum(x + bias[None, :, None, None], 0.0)
    flat = x.reshape(x.shape[0], -1)
    emb = jnp.maximum(
        jnp.dot(flat, torch_params["fc_w"].T, precision=lax.Precision.HIGHEST)
        + torch_params["fc_b"], 0.0)
    if bt is not None:
        emb = emb.reshape(bt + (emb.shape[-1],))
    return emb


if __name__ == "__main__":
    cfg = Config()
    input_shape = (16, 16, 4)                        # (H, W, C), as in the module
    key = jax.random.PRNGKey(0)
    key, pkey, xkey = jax.random.split(key, 3)

    torch_params = init_torch_params(pkey, input_shape, cfg)

    # NHWC observation batch (B, H, W, C) = (2, 16, 16, 4)
    x = jax.random.normal(xkey, (2, 16, 16, 4), jnp.float32)
    obs = {"image": x}

    ref = jax.block_until_ready(
        reference_forward(torch_params, obs, channels=input_shape[2]))

    # 1) f32-operand path: validates the unrolled-conv reformulation + fused kernel.
    params_f32 = prepare_params(torch_params, input_shape, compute_dtype=jnp.float32)
    emb_f32 = jax.block_until_ready(multi_encoder_forward(params_f32, obs))
    assert emb_f32.shape == (2, cfg.encoder_output_dimension), emb_f32.shape
    assert bool(jnp.all(jnp.isfinite(emb_f32)))
    err32 = float(jnp.max(jnp.abs(emb_f32 - ref)))
    assert jnp.allclose(emb_f32, ref, rtol=2e-2, atol=1e-2), err32

    # 2) bf16-operand path (production config): f32 accumulation, looser tolerance.
    params_bf16 = prepare_params(torch_params, input_shape, compute_dtype=jnp.bfloat16)
    emb = jax.block_until_ready(multi_encoder_forward(params_bf16, obs))
    assert emb.shape == (2, cfg.encoder_output_dimension), emb.shape
    assert bool(jnp.all(jnp.isfinite(emb)))
    err16 = float(jnp.max(jnp.abs(emb - ref)))
    assert jnp.allclose(emb, ref, rtol=5e-2, atol=2e-2), err16

    print("KERNEL_OK")
</pallas_src>

<mosaic_0001>
module attributes {stable_mosaic.version = 11 : i64} {
  func.func @_fused_encoder_kernel(%arg0: i32, %arg1: memref<2x1024xf32, #tpu.memory_space<vmem>>, %arg2: memref<1024x512xf32, #tpu.memory_space<vmem>>, %arg3: memref<1x512xf32, #tpu.memory_space<vmem>>, %arg4: memref<512x256xf32, #tpu.memory_space<vmem>>, %arg5: memref<1x256xf32, #tpu.memory_space<vmem>>, %arg6: memref<256x128xf32, #tpu.memory_space<vmem>>, %arg7: memref<1x128xf32, #tpu.memory_space<vmem>>, %arg8: memref<128x64xf32, #tpu.memory_space<vmem>>, %arg9: memref<1x64xf32, #tpu.memory_space<vmem>>, %arg10: memref<64x32xf32, #tpu.memory_space<vmem>>, %arg11: memref<1x32xf32, #tpu.memory_space<vmem>>, %arg12: memref<2x32xf32, #tpu.memory_space<vmem>>) attributes {dimension_semantics = [#tpu.dimension_semantics<parallel>], iteration_bounds = array<i64: 1>, scalar_prefetch = 0 : i64, scratch_operands = 0 : i64, tpu.core_type = #tpu.core_type<tc>, window_params = [{transform_indices = @transform_0, window_bounds = array<i64: 2, 1024>}, {pipeline_mode = #tpu.pipeline_mode<synchronous>, transform_indices = @transform_1, window_bounds = array<i64: 1024, 512>}, {pipeline_mode = #tpu.pipeline_mode<synchronous>, transform_indices = @transform_2, window_bounds = array<i64: 1, 512>}, {pipeline_mode = #tpu.pipeline_mode<synchronous>, transform_indices = @transform_3, window_bounds = array<i64: 512, 256>}, {pipeline_mode = #tpu.pipeline_mode<synchronous>, transform_indices = @transform_4, window_bounds = array<i64: 1, 256>}, {pipeline_mode = #tpu.pipeline_mode<synchronous>, transform_indices = @transform_5, window_bounds = array<i64: 256, 128>}, {pipeline_mode = #tpu.pipeline_mode<synchronous>, transform_indices = @transform_6, window_bounds = array<i64: 1, 128>}, {pipeline_mode = #tpu.pipeline_mode<synchronous>, transform_indices = @transform_7, window_bounds = array<i64: 128, 64>}, {pipeline_mode = #tpu.pipeline_mode<synchronous>, transform_indices = @transform_8, window_bounds = array<i64: 1, 64>}, {pipeline_mode = #tpu.pipeline_mode<synchronous>, transform_indices = @transform_9, window_bounds = array<i64: 64, 32>}, {pipeline_mode = #tpu.pipeline_mode<synchronous>, transform_indices = @transform_10, window_bounds = array<i64: 1, 32>}, {transform_indices = @transform_11, window_bounds = array<i64: 2, 32>}]} {
    %c0 = arith.constant 0 : index
    %c0_0 = arith.constant 0 : index
    %0 = vector.load %arg1[%c0, %c0_0] : memref<2x1024xf32, #tpu.memory_space<vmem>>, vector<2x1024xf32>
    %c0_1 = arith.constant 0 : index
    %c0_2 = arith.constant 0 : index
    %1 = vector.load %arg2[%c0_1, %c0_2] : memref<1024x512xf32, #tpu.memory_space<vmem>>, vector<1024x512xf32>
    %cst = arith.constant dense<0.000000e+00> : vector<2x512xf32>
    %2 = tpu.matmul %0, %1, %cst {dimension_numbers = #tpu.dot_dimension_numbers<[1], [0], [0], [1], [0, 0, 1, 1], [], []>} : vector<2x1024xf32>, vector<1024x512xf32>, vector<2x512xf32> -> vector<2x512xf32>
    %c0_3 = arith.constant 0 : index
    %c0_4 = arith.constant 0 : index
    %3 = vector.load %arg3[%c0_3, %c0_4] : memref<1x512xf32, #tpu.memory_space<vmem>>, vector<1x512xf32>
    %4 = vector.broadcast %3 : vector<1x512xf32> to vector<2x512xf32>
    %5 = arith.addf %2, %4 : vector<2x512xf32>
    %cst_5 = arith.constant 0.000000e+00 : f32
    %6 = vector.broadcast %cst_5 : f32 to vector<2x512xf32>
    %7 = arith.maximumf %5, %6 : vector<2x512xf32>
    %c0_6 = arith.constant 0 : index
    %c0_7 = arith.constant 0 : index
    %8 = vector.load %arg4[%c0_6, %c0_7] : memref<512x256xf32, #tpu.memory_space<vmem>>, vector<512x256xf32>
    %cst_8 = arith.constant dense<0.000000e+00> : vector<2x256xf32>
    %9 = tpu.matmul %7, %8, %cst_8 {dimension_numbers = #tpu.dot_dimension_numbers<[1], [0], [0], [1], [0, 0, 1, 1], [], []>} : vector<2x512xf32>, vector<512x256xf32>, vector<2x256xf32> -> vector<2x256xf32>
    %c0_9 = arith.constant 0 : index
    %c0_10 = arith.constant 0 : index
    %10 = vector.load %arg5[%c0_9, %c0_10] : memref<1x256xf32, #tpu.memory_space<vmem>>, vector<1x256xf32>
    %11 = vector.broadcast %10 : vector<1x256xf32> to vector<2x256xf32>
    %12 = arith.addf %9, %11 : vector<2x256xf32>
    %cst_11 = arith.constant 0.000000e+00 : f32
    %13 = vector.broadcast %cst_11 : f32 to vector<2x256xf32>
    %14 = arith.maximumf %12, %13 : vector<2x256xf32>
    %c0_12 = arith.constant 0 : index
    %c0_13 = arith.constant 0 : index
    %15 = vector.load %arg6[%c0_12, %c0_13] : memref<256x128xf32, #tpu.memory_space<vmem>>, vector<256x128xf32>
    %cst_14 = arith.constant dense<0.000000e+00> : vector<2x128xf32>
    %16 = tpu.matmul %14, %15, %cst_14 {dimension_numbers = #tpu.dot_dimension_numbers<[1], [0], [0], [1], [0, 0, 1, 1], [], []>} : vector<2x256xf32>, vector<256x128xf32>, vector<2x128xf32> -> vector<2x128xf32>
    %c0_15 = arith.constant 0 : index
    %c0_16 = arith.constant 0 : index
    %17 = vector.load %arg7[%c0_15, %c0_16] : memref<1x128xf32, #tpu.memory_space<vmem>>, vector<1x128xf32>
    %18 = vector.broadcast %17 : vector<1x128xf32> to vector<2x128xf32>
    %19 = arith.addf %16, %18 : vector<2x128xf32>
    %cst_17 = arith.constant 0.000000e+00 : f32
    %20 = vector.broadcast %cst_17 : f32 to vector<2x128xf32>
    %21 = arith.maximumf %19, %20 : vector<2x128xf32>
    %c0_18 = arith.constant 0 : index
    %c0_19 = arith.constant 0 : index
    %22 = vector.load %arg8[%c0_18, %c0_19] : memref<128x64xf32, #tpu.memory_space<vmem>>, vector<128x64xf32>
    %cst_20 = arith.constant dense<0.000000e+00> : vector<2x64xf32>
    %23 = tpu.matmul %21, %22, %cst_20 {dimension_numbers = #tpu.dot_dimension_numbers<[1], [0], [0], [1], [0, 0, 1, 1], [], []>} : vector<2x128xf32>, vector<128x64xf32>, vector<2x64xf32> -> vector<2x64xf32>
    %c0_21 = arith.constant 0 : index
    %c0_22 = arith.constant 0 : index
    %24 = vector.load %arg9[%c0_21, %c0_22] : memref<1x64xf32, #tpu.memory_space<vmem>>, vector<1x64xf32>
    %25 = vector.broadcast %24 : vector<1x64xf32> to vector<2x64xf32>
    %26 = arith.addf %23, %25 : vector<2x64xf32>
    %cst_23 = arith.constant 0.000000e+00 : f32
    %27 = vector.broadcast %cst_23 : f32 to vector<2x64xf32>
    %28 = arith.maximumf %26, %27 : vector<2x64xf32>
    %c0_24 = arith.constant 0 : index
    %c0_25 = arith.constant 0 : index
    %29 = vector.load %arg10[%c0_24, %c0_25] : memref<64x32xf32, #tpu.memory_space<vmem>>, vector<64x32xf32>
    %cst_26 = arith.constant dense<0.000000e+00> : vector<2x32xf32>
    %30 = tpu.matmul %28, %29, %cst_26 {dimension_numbers = #tpu.dot_dimension_numbers<[1], [0], [0], [1], [0, 0, 1, 1], [], []>} : vector<2x64xf32>, vector<64x32xf32>, vector<2x32xf32> -> vector<2x32xf32>
    %c0_27 = arith.constant 0 : index
    %c0_28 = arith.constant 0 : index
    %31 = vector.load %arg11[%c0_27, %c0_28] : memref<1x32xf32, #tpu.memory_space<vmem>>, vector<1x32xf32>
    %32 = vector.broadcast %31 : vector<1x32xf32> to vector<2x32xf32>
    %33 = arith.addf %30, %32 : vector<2x32xf32>
    %cst_29 = arith.constant 0.000000e+00 : f32
    %34 = vector.broadcast %cst_29 : f32 to vector<2x32xf32>
    %35 = arith.maximumf %33, %34 : vector<2x32xf32>
    %c0_30 = arith.constant 0 : index
    %c0_31 = arith.constant 0 : index
    %36 = vector.load %arg12[%c0_30, %c0_31] : memref<2x32xf32, #tpu.memory_space<vmem>>, vector<2x32xf32>
    tpu.vector_store %arg12[%c0_30, %c0_31], %35 {strides = array<i32>} : memref<2x32xf32, #tpu.memory_space<vmem>>, vector<2x32xf32>,
    return
  }
  func.func @transform_0(%arg0: i32) -> (i32, i32) {
    %c0_i32 = arith.constant 0 : i32
    %c0_i32_0 = arith.constant 0 : i32
    return %arg0, %c0_i32 : i32, i32
  }
  func.func @transform_1(%arg0: i32) -> (i32, i32) {
    %c0_i32 = arith.constant 0 : i32
    %c0_i32_0 = arith.constant 0 : i32
    %c0_i32_1 = arith.constant 0 : i32
    return %c0_i32, %c0_i32_0 : i32, i32
  }
  func.func @transform_2(%arg0: i32) -> (i32, i32) {
    %c0_i32 = arith.constant 0 : i32
    %c0_i32_0 = arith.constant 0 : i32
    %c0_i32_1 = arith.constant 0 : i32
    return %c0_i32, %c0_i32_0 : i32, i32
  }
  func.func @transform_3(%arg0: i32) -> (i32, i32) {
    %c0_i32 = arith.constant 0 : i32
    %c0_i32_0 = arith.constant 0 : i32
    %c0_i32_1 = arith.constant 0 : i32
    return %c0_i32, %c0_i32_0 : i32, i32
  }
  func.func @transform_4(%arg0: i32) -> (i32, i32) {
    %c0_i32 = arith.constant 0 : i32
    %c0_i32_0 = arith.constant 0 : i32
    %c0_i32_1 = arith.constant 0 : i32
    return %c0_i32, %c0_i32_0 : i32, i32
  }
  func.func @transform_5(%arg0: i32) -> (i32, i32) {
    %c0_i32 = arith.constant 0 : i32
    %c0_i32_0 = arith.constant 0 : i32
    %c0_i32_1 = arith.constant 0 : i32
    return %c0_i32, %c0_i32_0 : i32, i32
  }
  func.func @transform_6(%arg0: i32) -> (i32, i32) {
    %c0_i32 = arith.constant 0 : i32
    %c0_i32_0 = arith.constant 0 : i32
    %c0_i32_1 = arith.constant 0 : i32
    return %c0_i32, %c0_i32_0 : i32, i32
  }
  func.func @transform_7(%arg0: i32) -> (i32, i32) {
    %c0_i32 = arith.constant 0 : i32
    %c0_i32_0 = arith.constant 0 : i32
    %c0_i32_1 = arith.constant 0 : i32
    return %c0_i32, %c0_i32_0 : i32, i32
  }
  func.func @transform_8(%arg0: i32) -> (i32, i32) {
    %c0_i32 = arith.constant 0 : i32
    %c0_i32_0 = arith.constant 0 : i32
    %c0_i32_1 = arith.constant 0 : i32
    return %c0_i32, %c0_i32_0 : i32, i32
  }
  func.func @transform_9(%arg0: i32) -> (i32, i32) {
    %c0_i32 = arith.constant 0 : i32
    %c0_i32_0 = arith.constant 0 : i32
    %c0_i32_1 = arith.constant 0 : i32
    return %c0_i32, %c0_i32_0 : i32, i32
  }
  func.func @transform_10(%arg0: i32) -> (i32, i32) {
    %c0_i32 = arith.constant 0 : i32
    %c0_i32_0 = arith.constant 0 : i32
    %c0_i32_1 = arith.constant 0 : i32
    return %c0_i32, %c0_i32_0 : i32, i32
  }
  func.func @transform_11(%arg0: i32) -> (i32, i32) {
    %c0_i32 = arith.constant 0 : i32
    %c0_i32_0 = arith.constant 0 : i32
    return %arg0, %c0_i32 : i32, i32
  }
}

</mosaic_0001>

<bundles_post_ra>
// kernel: _encode_jit.1
= control target key start
LH: loop header
LB: loop body
LE: loop exit
PB: predicated region body
PF: predicated region fallthrough
CT: control target
= control target key end

     0   :  { %16 = vsyncpa [#allocation3], 0  ;;  %s2378_s0 = inlined_call_operand.hbm [shape: f32[2,1024], index: 0, kind: input, shape index: {}]   ;;  %s2379_s1 = inlined_call_operand.hbm [shape: f32[1024,512], index: 1, kind: input, shape index: {}]   ;;  %s2380_s2 = inlined_call_operand.hbm [shape: f32[1,512], index: 2, kind: input, shape index: {}]   ;;  %s2381_s3 = inlined_call_operand.hbm [shape: f32[512,256], index: 3, kind: input, shape index: {}]   ;;  %s2382_s4 = inlined_call_operand.hbm [shape: f32[1,256], index: 4, kind: input, shape index: {}]   ;;  %s2383_s5 = inlined_call_operand.hbm [shape: f32[256,128], index: 5, kind: input, shape index: {}]   ;;  %s2384_s6 = inlined_call_operand.hbm [shape: f32[1,128], index: 6, kind: input, shape index: {}]   ;;  %s2385_s7 = inlined_call_operand.vmem [shape: f32[128,64], index: 7, kind: input, shape index: {}]   ;;  %s2386_s8 = inlined_call_operand.hbm [shape: f32[1,64], index: 8, kind: input, shape index: {}]   ;;  %s2387_s9 = inlined_call_operand.vmem [shape: f32[64,32], index: 9, kind: input, shape index: {}]   ;;  %s2388_s10 = inlined_call_operand.hbm [shape: f32[1,32], index: 10, kind: input, shape index: {}]   ;;  %s2389_s11 = inlined_call_operand.hbm [shape: f32[2,32], index: 11, kind: output, shape index: {}]  }
   0x1   :  { %17 = vsyncpa [#allocation6], 0 }
   0x2   :  { %18 = vsyncpa [#allocation9], 0 }
   0x3   :  { %19 = vsyncpa [#allocation12], 0 }
   0x4   :  { %20 = vsyncpa [#allocation15], 0  ;;  %s37_s19 = sshll.u32 %s2379_s1, 4  ;;  %s38_s19 = int_to_ptr.hbm [resolvable:$true] %s37_s19 }
   0x5   :  { %21 = vsyncpa [#allocation4], 0  ;;  %s2110_s20 = smov [#allocation5]   ;;  %s61_s24 = sshll.u32 %s2381_s3, 4  ;;  %s62_s24 = int_to_ptr.hbm [resolvable:$true] %s61_s24 }
   0x6   :  { %s39_s21 = sshll.u32 %s2110_s20, 4  ;;  %s2111_s25 = smov 512   ;;  %s40_s21 = int_to_ptr.vmem [resolvable:$true] %s39_s21 }
   0x7   :  { %s2112_s26 = smov 32   ;;  %s2113_s27 = smov [#allocation8]  }
   0x8   :  { %45 = dma.hbm_to_vmem [thread:$0]  %s38_s19, 65536, %s40_s21, [#allocation6], %s2111_s25, %s2111_s25, %s2112_s26  }
   0x9   :  { %s63_s28 = sshll.u32 %s2113_s27, 4  ;;  %s2114_s29 = smov 256   ;;  %s64_s28 = int_to_ptr.vmem [resolvable:$true] %s63_s28 }
   0xa   :  { %s2115_s30 = smov 16   ;;  %s85_s13 = sshll.u32 %s2383_s5, 4  ;;  %s86_s13 = int_to_ptr.hbm [resolvable:$true] %s85_s13 }
   0xb   :  { %69 = dma.hbm_to_vmem [thread:$0]  %s62_s24, 16384, %s64_s28, [#allocation9], %s2114_s29, %s2114_s29, %s2115_s30  }
   0xc   :  { %s2116_s14 = smov [#allocation11]   ;;  %s112_s17 = sshll.u32 %s2386_s8, 4  ;;  %s113_s17 = int_to_ptr.hbm [resolvable:$true] %s112_s17 }
   0xd   :  { %s87_s15 = sshll.u32 %s2116_s14, 4  ;;  %s2117_s18 = smov 128   ;;  %s88_s15 = int_to_ptr.vmem [resolvable:$true] %s87_s15 }
   0xe   :  { %s2118_s19 = smov 8   ;;  %s2119_s20 = smov [#allocation14]  }
   0xf   :  { %93 = dma.hbm_to_vmem [thread:$0]  %s86_s13, 4096, %s88_s15, [#allocation12], %s2117_s18, %s2117_s18, %s2118_s19  }
  0x10   :  { %s114_s21 = sshll.u32 %s2119_s20, 4  ;;  %s27_s24 = sshll.u32 %s2378_s0, 4  ;;  %s115_s21 = int_to_ptr.vmem [resolvable:$true] %s114_s21  ;;  %s28_s24 = int_to_ptr.hbm [resolvable:$true] %s27_s24 }
  0x11   :  { %117 = dma.hbm_to_vmem [thread:$0]  %s113_s17, 16, %s115_s21, [#allocation15]  }
  0x12   :  { %s51_s26 = sshll.u32 %s2380_s2, 4  ;;  %s2120_s27 = smov [#allocation2]   ;;  %s52_s26 = int_to_ptr.hbm [resolvable:$true] %s51_s26 }
  0x13   :  { %s29_s28 = sshll.u32 %s2120_s27, 4  ;;  %s2121_s8 = smov [#allocation7]   ;;  %s30_s28 = int_to_ptr.vmem [resolvable:$true] %s29_s28 }
  0x14   :  { %32 = dma.hbm_to_vmem [thread:$0]  %s28_s24, 256, %s30_s28, [#allocation3]  }
  0x15   :  { %s53_s29 = sshll.u32 %s2121_s8, 4  ;;  %s75_s12 = sshll.u32 %s2382_s4, 4  ;;  %s54_s29 = int_to_ptr.vmem [resolvable:$true] %s53_s29  ;;  %s76_s12 = int_to_ptr.hbm [resolvable:$true] %s75_s12 }
  0x16   :  { %56 = dma.hbm_to_vmem [thread:$0]  %s52_s26, 64, %s54_s29, [#allocation6]  }
  0x17   :  { %s99_s14 = sshll.u32 %s2384_s6, 4  ;;  %s2122_s15 = smov [#allocation10]   ;;  %s100_s14 = int_to_ptr.hbm [resolvable:$true] %s99_s14 }
  0x18   :  { %s77_s2 = sshll.u32 %s2122_s15, 4  ;;  %s2123_s16 = smov [#allocation13]   ;;  %s78_s2 = int_to_ptr.vmem [resolvable:$true] %s77_s2 }
  0x19   :  { %80 = dma.hbm_to_vmem [thread:$0]  %s76_s12, 32, %s78_s2, [#allocation9]  }
  0x1a   :  { %s101_s3 = sshll.u32 %s2123_s16, 4  ;;  %s125_s19 = sshll.u32 %s2388_s10, 4  ;;  %s102_s3 = int_to_ptr.vmem [resolvable:$true] %s101_s3  ;;  %s126_s19 = int_to_ptr.hbm [resolvable:$true] %s125_s19 }
  0x1b   :  { %104 = dma.hbm_to_vmem [thread:$0]  %s100_s14, 16, %s102_s3, [#allocation12]  }
  0x1c   :  { %s2124_s4 = smov [#allocation16]  }
  0x1d   :  { %s127_s20 = sshll.u32 %s2124_s4, 4  ;;  %s128_s20 = int_to_ptr.vmem [resolvable:$true] %s127_s20 }
  0x1e   :  { %130 = dma.hbm_to_vmem [thread:$0]  %s126_s19, 16, %s128_s20, [#allocation15]  }
  0x1f   :  { %2098 = dma.done.wait [#allocation3], 256  }
  0x20   :  { %2099 = vsyncadd [#allocation3], 4294967040 }
  0x21   :  { %2100 = dma.done.wait [#allocation6], 65600  }
  0x22   :  { %2101 = vsyncadd [#allocation6], 4294901696 }
  0x23   :  { %2102 = dma.done.wait [#allocation9], 16416  }
  0x24   :  { %2103 = vsyncadd [#allocation9], 4294950880 }
  0x25   :  { %2104 = dma.done.wait [#allocation12], 4112  }
  0x26   :  { %2105 = vsyncadd [#allocation12], 4294963184 }
  0x27   :  { %2106 = dma.done.wait [#allocation15], 32  }
  0x28   :  { %2107 = vsyncadd [#allocation15], 4294967264  ;;  %v229_v0 = vld [vmem:[#allocation5 + $0x1e0] sm:$0xff]  ;;  %vm1782_vm0 = vcmask 523264   ;;  %s2125_s15 = smov [#allocation17]   ;;  %s1816_s17 = sshll.u32 %s2389_s11, 4  ;;  %s1817_s17 = int_to_ptr.hbm [resolvable:$true] %s1816_s17 }
  0x29   :  { %v293_v1 = vld [vmem:[#allocation5 + $0x3e0] sm:$0xff]  ;;  %712 = vmatpush.msra.mxu0 %v229_v0  ;;  %s1814_s2 = sshll.u32 %s2125_s15, 4  ;;  %vm1807_vm1 = vcmask 254976   ;;  %s1815_s2 = int_to_ptr.vmem [resolvable:$true] %s1814_s2 }
  0x2a   :  { %v357_v2 = vld [vmem:[#allocation5 + $0x5e0] sm:$0xff]  ;;  %732 = vmatpush.msra.mxu1 %v293_v1 }
  0x2b   :  { %v225_v3 = vld [vmem:[#allocation5 + $0x1c0] sm:$0xff]  ;;  %752 = vmatpush.msra.mxu2 %v357_v2 }
  0x2c   :  { %v289_v4 = vld [vmem:[#allocation5 + $0x3c0] sm:$0xff]  ;;  %713 = vmatpush.msra.mxu0 %v225_v3 }
  0x2d   :  { %v353_v5 = vld [vmem:[#allocation5 + $0x5c0] sm:$0xff]  ;;  %733 = vmatpush.msra.mxu1 %v289_v4 }
  0x2e   :  { %v421_v6 = vld [vmem:[#allocation5 + $0x7e0] sm:$0xff]  ;;  %753 = vmatpush.msra.mxu2 %v353_v5 }
  0x2f   :  { %v221_v7 = vld [vmem:[#allocation5 + $0x1a0] sm:$0xff]  ;;  %772 = vmatpush.msra.mxu3 %v421_v6 }
  0x30   :  { %v285_v8 = vld [vmem:[#allocation5 + $0x3a0] sm:$0xff]  ;;  %714 = vmatpush.msra.mxu0 %v221_v7 }
  0x31   :  { %v349_v9 = vld [vmem:[#allocation5 + $0x5a0] sm:$0xff]  ;;  %734 = vmatpush.msra.mxu1 %v285_v8 }
  0x32   :  { %v417_v10 = vld [vmem:[#allocation5 + $0x7c0] sm:$0xff]  ;;  %754 = vmatpush.msra.mxu2 %v349_v9 }
  0x33   :  { %v217_v11 = vld [vmem:[#allocation5 + $0x180] sm:$0xff]  ;;  %773 = vmatpush.msra.mxu3 %v417_v10 }
  0x34   :  { %v281_v12 = vld [vmem:[#allocation5 + $0x380] sm:$0xff]  ;;  %715 = vmatpush.msra.mxu0 %v217_v11 }
  0x35   :  { %v345_v13 = vld [vmem:[#allocation5 + $0x580] sm:$0xff]  ;;  %735 = vmatpush.msra.mxu1 %v281_v12 }
  0x36   :  { %v413_v14 = vld [vmem:[#allocation5 + $0x7a0] sm:$0xff]  ;;  %755 = vmatpush.msra.mxu2 %v345_v13 }
  0x37   :  { %v213_v15 = vld [vmem:[#allocation5 + $0x160] sm:$0xff]  ;;  %774 = vmatpush.msra.mxu3 %v413_v14 }
  0x38   :  { %v277_v16 = vld [vmem:[#allocation5 + $0x360] sm:$0xff]  ;;  %716 = vmatpush.msra.mxu0 %v213_v15 }
  0x39   :  { %v341_v17 = vld [vmem:[#allocation5 + $0x560] sm:$0xff]  ;;  %736 = vmatpush.msra.mxu1 %v277_v16 }
  0x3a   :  { %v409_v18 = vld [vmem:[#allocation5 + $0x780] sm:$0xff]  ;;  %756 = vmatpush.msra.mxu2 %v341_v17 }
  0x3b   :  { %v209_v19 = vld [vmem:[#allocation5 + $0x140] sm:$0xff]  ;;  %775 = vmatpush.msra.mxu3 %v409_v18 }
  0x3c   :  { %v273_v20 = vld [vmem:[#allocation5 + $0x340] sm:$0xff]  ;;  %717 = vmatpush.msra.mxu0 %v209_v19 }
  0x3d   :  { %v337_v21 = vld [vmem:[#allocation5 + $0x540] sm:$0xff]  ;;  %737 = vmatpush.msra.mxu1 %v273_v20 }
  0x3e   :  { %v405_v22 = vld [vmem:[#allocation5 + $0x760] sm:$0xff]  ;;  %757 = vmatpush.msra.mxu2 %v337_v21 }
  0x3f   :  { %v205_v23 = vld [vmem:[#allocation5 + $0x120] sm:$0xff]  ;;  %776 = vmatpush.msra.mxu3 %v405_v22 }
  0x40   :  { %v269_v24 = vld [vmem:[#allocation5 + $0x320] sm:$0xff]  ;;  %718 = vmatpush.msra.mxu0 %v205_v23 }
  0x41   :  { %v333_v25 = vld [vmem:[#allocation5 + $0x520] sm:$0xff]  ;;  %738 = vmatpush.msra.mxu1 %v269_v24 }
  0x42   :  { %v401_v26 = vld [vmem:[#allocation5 + $0x740] sm:$0xff]  ;;  %758 = vmatpush.msra.mxu2 %v333_v25  ;;  %v167_v25 = vld [vmem:[#allocation2] sm:$0xff] }
  0x43   :  { %v201_v27 = vld [vmem:[#allocation5 + $0x100] sm:$0xff]  ;;  %777 = vmatpush.msra.mxu3 %v401_v26  ;;  %693 = vst [vmem:[#allocation1] ss:$4 sm:$0xff] %v167_v25  ;;  %v410_v25 = vld [vmem:[#allocation5 + $0x788] sm:$0xff] }
  0x44   :  { %v265_v28 = vld [vmem:[#allocation5 + $0x300] sm:$0xff]  ;;  %719 = vmatpush.msra.mxu0 %v201_v27 }
  0x45   :  { %v329_v29 = vld [vmem:[#allocation5 + $0x500] sm:$0xff]  ;;  %739 = vmatpush.msra.mxu1 %v265_v28 }
  0x46   :  { %v397_v30 = vld [vmem:[#allocation5 + $0x720] sm:$0xff]  ;;  %759 = vmatpush.msra.mxu2 %v329_v29 }
  0x47   :  { %v197_v31 = vld [vmem:[#allocation5 + $0xe0] sm:$0xff]  ;;  %778 = vmatpush.msra.mxu3 %v397_v30 }
  0x48   :  { %v261_v32 = vld [vmem:[#allocation5 + $0x2e0] sm:$0xff]  ;;  %720 = vmatpush.msra.mxu0 %v197_v31 }
  0x49   :  { %v325_v33 = vld [vmem:[#allocation5 + $0x4e0] sm:$0xff]  ;;  %740 = vmatpush.msra.mxu1 %v261_v32 }
  0x4a   :  { %v393_v34 = vld [vmem:[#allocation5 + $0x700] sm:$0xff]  ;;  %760 = vmatpush.msra.mxu2 %v325_v33 }
  0x4b   :  { %v193_v35 = vld [vmem:[#allocation5 + $0xc0] sm:$0xff]  ;;  %779 = vmatpush.msra.mxu3 %v393_v34 }
  0x4c   :  { %v257_v36 = vld [vmem:[#allocation5 + $0x2c0] sm:$0xff]  ;;  %721 = vmatpush.msra.mxu0 %v193_v35 }
  0x4d   :  { %v321_v37 = vld [vmem:[#allocation5 + $0x4c0] sm:$0xff]  ;;  %741 = vmatpush.msra.mxu1 %v257_v36 }
  0x4e   :  { %v389_v38 = vld [vmem:[#allocation5 + $0x6e0] sm:$0xff]  ;;  %761 = vmatpush.msra.mxu2 %v321_v37 }
  0x4f   :  { %v189_v39 = vld [vmem:[#allocation5 + $0xa0] sm:$0xff]  ;;  %780 = vmatpush.msra.mxu3 %v389_v38  ;;  %v168_v38 = vld [vmem:[#allocation2 + $0x8] sm:$0xff] }
  0x50   :  { %v253_v40 = vld [vmem:[#allocation5 + $0x2a0] sm:$0xff]  ;;  %722 = vmatpush.msra.mxu0 %v189_v39  ;;  %695 = vst [vmem:[#allocation1 + $0x20] ss:$4 sm:$0xff] %v168_v38  ;;  %v266_v38 = vld [vmem:[#allocation5 + $0x308] sm:$0xff] }
  0x51   :  { %v317_v41 = vld [vmem:[#allocation5 + $0x4a0] sm:$0xff]  ;;  %742 = vmatpush.msra.mxu1 %v253_v40 }
  0x52   :  { %v385_v42 = vld [vmem:[#allocation5 + $0x6c0] sm:$0xff]  ;;  %762 = vmatpush.msra.mxu2 %v317_v41 }
  0x53   :  { %v185_v43 = vld [vmem:[#allocation5 + $0x80] sm:$0xff]  ;;  %781 = vmatpush.msra.mxu3 %v385_v42 }
  0x54   :  { %v249_v44 = vld [vmem:[#allocation5 + $0x280] sm:$0xff]  ;;  %723 = vmatpush.msra.mxu0 %v185_v43 }
  0x55   :  { %v313_v45 = vld [vmem:[#allocation5 + $0x480] sm:$0xff]  ;;  %743 = vmatpush.msra.mxu1 %v249_v44 }
  0x56   :  { %v381_v46 = vld [vmem:[#allocation5 + $0x6a0] sm:$0xff]  ;;  %763 = vmatpush.msra.mxu2 %v313_v45 }
  0x57   :  { %v181_v47 = vld [vmem:[#allocation5 + $0x60] sm:$0xff]  ;;  %782 = vmatpush.msra.mxu3 %v381_v46 }
  0x58   :  { %v245_v48 = vld [vmem:[#allocation5 + $0x260] sm:$0xff]  ;;  %724 = vmatpush.msra.mxu0 %v181_v47 }
  0x59   :  { %v309_v49 = vld [vmem:[#allocation5 + $0x460] sm:$0xff]  ;;  %744 = vmatpush.msra.mxu1 %v245_v48 }
  0x5a   :  { %v377_v50 = vld [vmem:[#allocation5 + $0x680] sm:$0xff]  ;;  %764 = vmatpush.msra.mxu2 %v309_v49 }
  0x5b   :  { %v177_v51 = vld [vmem:[#allocation5 + $0x40] sm:$0xff]  ;;  %783 = vmatpush.msra.mxu3 %v377_v50 }
  0x5c   :  { %v241_v52 = vld [vmem:[#allocation5 + $0x240] sm:$0xff]  ;;  %725 = vmatpush.msra.mxu0 %v177_v51 }
  0x5d   :  { %v305_v53 = vld [vmem:[#allocation5 + $0x440] sm:$0xff]  ;;  %745 = vmatpush.msra.mxu1 %v241_v52 }
  0x5e   :  { %v373_v54 = vld [vmem:[#allocation5 + $0x660] sm:$0xff]  ;;  %765 = vmatpush.msra.mxu2 %v305_v53 }
  0x5f   :  { %v173_v55 = vld [vmem:[#allocation5 + $0x20] sm:$0xff]  ;;  %784 = vmatpush.msra.mxu3 %v373_v54 }
  0x60   :  { %v237_v56 = vld [vmem:[#allocation5 + $0x220] sm:$0xff]  ;;  %726 = vmatpush.msra.mxu0 %v173_v55 }
  0x61   :  { %v301_v57 = vld [vmem:[#allocation5 + $0x420] sm:$0xff]  ;;  %746 = vmatpush.msra.mxu1 %v237_v56 }
  0x62   :  { %v369_v58 = vld [vmem:[#allocation5 + $0x640] sm:$0xff]  ;;  %766 = vmatpush.msra.mxu2 %v301_v57 }
  0x63   :  { %v169_v59 = vld [vmem:[#allocation5] sm:$0xff]  ;;  %785 = vmatpush.msra.mxu3 %v369_v58 }
  0x64   :  { %v233_v60 = vld [vmem:[#allocation5 + $0x200] sm:$0xff]  ;;  %727 = vmatpush.msra.mxu0 %v169_v59 }
  0x65   :  { %v297_v61 = vld [vmem:[#allocation5 + $0x400] sm:$0xff]  ;;  %747 = vmatpush.msra.mxu1 %v233_v60 }
  0x66   :  { %v365_v62 = vld [vmem:[#allocation5 + $0x620] sm:$0xff]  ;;  %767 = vmatpush.msra.mxu2 %v297_v61 }
  0x67   :  { %v485_v63 = vld [vmem:[#allocation5 + $0x9e0] sm:$0xff]  ;;  %786 = vmatpush.msra.mxu3 %v365_v62 }
  0x68   :  { %v549_v0 = vld [vmem:[#allocation5 + $0xbe0] sm:$0xff]  ;;  %792 = vmatpush.msrb.mxu0 %v485_v63 }
  0x69   :  { %v613_v1 = vld [vmem:[#allocation5 + $0xde0] sm:$0xff]  ;;  %812 = vmatpush.msrb.mxu1 %v549_v0 }
  0x6a   :  { %v361_v2 = vld [vmem:[#allocation5 + $0x600] sm:$0xff]  ;;  %832 = vmatpush.msrb.mxu2 %v613_v1  ;;  %v2213_v1 = vld.sshfl [vmem:[#allocation1] sm:$0xff pattern:$0x73625140] }
  0x6b   :  { %v481_v3 = vld [vmem:[#allocation5 + $0x9c0] sm:$0xff]  ;;  %787 = vmatpush.msra.mxu3 %v361_v2  ;;  %v2215_v2 = vld.sshfl [vmem:[#allocation1 + $0x8] sm:$0xff pattern:$0x73625140]  ;;  %728 = vmatmul.f32.vlgmr.msra.gmra.mxu0 %v2213_v1 }
  0x6c   :  { %v545_v4 = vld [vmem:[#allocation5 + $0xbc0] sm:$0xff]  ;;  %793 = vmatpush.msrb.mxu0 %v481_v3  ;;  %v2217_v3 = vld.sshfl [vmem:[#allocation1 + $0x10] sm:$0xff pattern:$0x73625140]  ;;  %748 = vmatmul.f32.vlgmr.msra.gmra.mxu1 %v2215_v2 }
  0x6d   :  { %v609_v5 = vld [vmem:[#allocation5 + $0xdc0] sm:$0xff]  ;;  %813 = vmatpush.msrb.mxu1 %v545_v4  ;;  %v230_v4 = vld [vmem:[#allocation5 + $0x1e8] sm:$0xff]  ;;  %768 = vmatmul.f32.vlgmr.msra.gmra.mxu2 %v2217_v3 }
  0x6e   :  { %v677_v6 = vld [vmem:[#allocation5 + $0xfe0] sm:$0xff]  ;;  %833 = vmatpush.msrb.mxu2 %v609_v5  ;;  %v294_v5 = vld [vmem:[#allocation5 + $0x3e8] sm:$0xff] }
  0x6f   :  { %v477_v7 = vld [vmem:[#allocation5 + $0x9a0] sm:$0xff]  ;;  %852 = vmatpush.msrb.mxu3 %v677_v6  ;;  %v358_v6 = vld [vmem:[#allocation5 + $0x5e8] sm:$0xff] }
  0x70   :  { %v541_v8 = vld [vmem:[#allocation5 + $0xba0] sm:$0xff]  ;;  %794 = vmatpush.msrb.mxu0 %v477_v7 }
  0x71   :  { %v605_v9 = vld [vmem:[#allocation5 + $0xda0] sm:$0xff]  ;;  %814 = vmatpush.msrb.mxu1 %v541_v8  ;;  %v226_v8 = vld [vmem:[#allocation5 + $0x1c8] sm:$0xff] }
  0x72   :  { %v673_v10 = vld [vmem:[#allocation5 + $0xfc0] sm:$0xff]  ;;  %834 = vmatpush.msrb.mxu2 %v605_v9 }
  0x73   :  { %v473_v11 = vld [vmem:[#allocation5 + $0x980] sm:$0xff]  ;;  %853 = vmatpush.msrb.mxu3 %v673_v10  ;;  %v290_v10 = vld [vmem:[#allocation5 + $0x3c8] sm:$0xff] }
  0x74   :  { %v537_v12 = vld [vmem:[#allocation5 + $0xb80] sm:$0xff]  ;;  %795 = vmatpush.msrb.mxu0 %v473_v11  ;;  %v354_v11 = vld [vmem:[#allocation5 + $0x5c8] sm:$0xff] }
  0x75   :  { %v601_v13 = vld [vmem:[#allocation5 + $0xd80] sm:$0xff]  ;;  %815 = vmatpush.msrb.mxu1 %v537_v12  ;;  %v422_v12 = vld [vmem:[#allocation5 + $0x7e8] sm:$0xff] }
  0x76   :  { %v669_v14 = vld [vmem:[#allocation5 + $0xfa0] sm:$0xff]  ;;  %835 = vmatpush.msrb.mxu2 %v601_v13  ;;  %v222_v13 = vld [vmem:[#allocation5 + $0x1a8] sm:$0xff] }
  0x77   :  { %v469_v15 = vld [vmem:[#allocation5 + $0x960] sm:$0xff]  ;;  %854 = vmatpush.msrb.mxu3 %v669_v14  ;;  %v286_v14 = vld [vmem:[#allocation5 + $0x3a8] sm:$0xff] }
  0x78   :  { %v533_v16 = vld [vmem:[#allocation5 + $0xb60] sm:$0xff]  ;;  %796 = vmatpush.msrb.mxu0 %v469_v15  ;;  %v350_v15 = vld [vmem:[#allocation5 + $0x5a8] sm:$0xff] }
  0x79   :  { %v597_v17 = vld [vmem:[#allocation5 + $0xd60] sm:$0xff]  ;;  %816 = vmatpush.msrb.mxu1 %v533_v16  ;;  %v418_v16 = vld [vmem:[#allocation5 + $0x7c8] sm:$0xff] }
  0x7a   :  { %v665_v18 = vld [vmem:[#allocation5 + $0xf80] sm:$0xff]  ;;  %836 = vmatpush.msrb.mxu2 %v597_v17  ;;  %v218_v17 = vld [vmem:[#allocation5 + $0x188] sm:$0xff] }
  0x7b   :  { %v465_v19 = vld [vmem:[#allocation5 + $0x940] sm:$0xff]  ;;  %855 = vmatpush.msrb.mxu3 %v665_v18  ;;  %v282_v18 = vld [vmem:[#allocation5 + $0x388] sm:$0xff] }
  0x7c   :  { %v529_v20 = vld [vmem:[#allocation5 + $0xb40] sm:$0xff]  ;;  %797 = vmatpush.msrb.mxu0 %v465_v19  ;;  %v346_v19 = vld [vmem:[#allocation5 + $0x588] sm:$0xff] }
  0x7d   :  { %v593_v21 = vld [vmem:[#allocation5 + $0xd40] sm:$0xff]  ;;  %817 = vmatpush.msrb.mxu1 %v529_v20  ;;  %v414_v20 = vld [vmem:[#allocation5 + $0x7a8] sm:$0xff] }
  0x7e   :  { %v661_v22 = vld [vmem:[#allocation5 + $0xf60] sm:$0xff]  ;;  %837 = vmatpush.msrb.mxu2 %v593_v21  ;;  %v2225_v21 = vld.sshfl [vmem:[#allocation1 + $0x30] sm:$0xff pattern:$0x73625140] }
  0x7f   :  { %v461_v23 = vld [vmem:[#allocation5 + $0x920] sm:$0xff]  ;;  %856 = vmatpush.msrb.mxu3 %v661_v22  ;;  %v214_v22 = vld [vmem:[#allocation5 + $0x168] sm:$0xff] }
  0x80   :  { %v525_v24 = vld [vmem:[#allocation5 + $0xb20] sm:$0xff]  ;;  %798 = vmatpush.msrb.mxu0 %v461_v23  ;;  %v278_v23 = vld [vmem:[#allocation5 + $0x368] sm:$0xff] }
  0x81   :  { %v589_v26 = vld [vmem:[#allocation5 + $0xd20] sm:$0xff]  ;;  %818 = vmatpush.msrb.mxu1 %v525_v24  ;;  %v342_v24 = vld [vmem:[#allocation5 + $0x568] sm:$0xff] }
  0x82   :  { %v657_v27 = vld [vmem:[#allocation5 + $0xf40] sm:$0xff]  ;;  %838 = vmatpush.msrb.mxu2 %v589_v26  ;;  %v2227_v26 = vld.sshfl [vmem:[#allocation1 + $0x20] sm:$0xff pattern:$0x73625140] }
  0x83   :  { %v457_v28 = vld [vmem:[#allocation5 + $0x900] sm:$0xff]  ;;  %857 = vmatpush.msrb.mxu3 %v657_v27 }
  0x84   :  { %v521_v29 = vld [vmem:[#allocation5 + $0xb00] sm:$0xff]  ;;  %799 = vmatpush.msrb.mxu0 %v457_v28  ;;  %v210_v28 = vld [vmem:[#allocation5 + $0x148] sm:$0xff] }
  0x85   :  { %v585_v30 = vld [vmem:[#allocation5 + $0xd00] sm:$0xff]  ;;  %819 = vmatpush.msrb.mxu1 %v521_v29  ;;  %v274_v29 = vld [vmem:[#allocation5 + $0x348] sm:$0xff] }
  0x86   :  { %v653_v31 = vld [vmem:[#allocation5 + $0xf20] sm:$0xff]  ;;  %839 = vmatpush.msrb.mxu2 %v585_v30  ;;  %v338_v30 = vld [vmem:[#allocation5 + $0x548] sm:$0xff] }
  0x87   :  { %v453_v32 = vld [vmem:[#allocation5 + $0x8e0] sm:$0xff]  ;;  %858 = vmatpush.msrb.mxu3 %v653_v31  ;;  %v406_v31 = vld [vmem:[#allocation5 + $0x768] sm:$0xff] }
  0x88   :  { %v517_v33 = vld [vmem:[#allocation5 + $0xae0] sm:$0xff]  ;;  %800 = vmatpush.msrb.mxu0 %v453_v32  ;;  %v2233_v32 = vld.sshfl [vmem:[#allocation1 + $0x28] sm:$0xff pattern:$0x73625140] }
  0x89   :  { %v581_v34 = vld [vmem:[#allocation5 + $0xce0] sm:$0xff]  ;;  %820 = vmatpush.msrb.mxu1 %v517_v33  ;;  %v206_v33 = vld [vmem:[#allocation5 + $0x128] sm:$0xff] }
  0x8a   :  { %v649_v35 = vld [vmem:[#allocation5 + $0xf00] sm:$0xff]  ;;  %840 = vmatpush.msrb.mxu2 %v581_v34  ;;  %v270_v34 = vld [vmem:[#allocation5 + $0x328] sm:$0xff] }
  0x8b   :  { %v449_v36 = vld [vmem:[#allocation5 + $0x8c0] sm:$0xff]  ;;  %859 = vmatpush.msrb.mxu3 %v649_v35  ;;  %v334_v35 = vld [vmem:[#allocation5 + $0x528] sm:$0xff] }
  0x8c   :  { %v513_v37 = vld [vmem:[#allocation5 + $0xac0] sm:$0xff]  ;;  %801 = vmatpush.msrb.mxu0 %v449_v36  ;;  %v402_v36 = vld [vmem:[#allocation5 + $0x748] sm:$0xff] }
  0x8d   :  { %v577_v39 = vld [vmem:[#allocation5 + $0xcc0] sm:$0xff]  ;;  %821 = vmatpush.msrb.mxu1 %v513_v37  ;;  %v202_v37 = vld [vmem:[#allocation5 + $0x108] sm:$0xff] }
  0x8e   :  { %v645_v40 = vld [vmem:[#allocation5 + $0xee0] sm:$0xff]  ;;  %841 = vmatpush.msrb.mxu2 %v577_v39  ;;  %v330_v39 = vld [vmem:[#allocation5 + $0x508] sm:$0xff] }
  0x8f   :  { %v445_v41 = vld [vmem:[#allocation5 + $0x8a0] sm:$0xff]  ;;  %860 = vmatpush.msrb.mxu3 %v645_v40  ;;  %v398_v40 = vld [vmem:[#allocation5 + $0x728] sm:$0xff] }
  0x90   :  { %v509_v42 = vld [vmem:[#allocation5 + $0xaa0] sm:$0xff]  ;;  %802 = vmatpush.msrb.mxu0 %v445_v41  ;;  %v198_v41 = vld [vmem:[#allocation5 + $0xe8] sm:$0xff] }
  0x91   :  { %v573_v43 = vld [vmem:[#allocation5 + $0xca0] sm:$0xff]  ;;  %822 = vmatpush.msrb.mxu1 %v509_v42  ;;  %v262_v42 = vld [vmem:[#allocation5 + $0x2e8] sm:$0xff] }
  0x92   :  { %v641_v44 = vld [vmem:[#allocation5 + $0xec0] sm:$0xff]  ;;  %842 = vmatpush.msrb.mxu2 %v573_v43  ;;  %v326_v43 = vld [vmem:[#allocation5 + $0x4e8] sm:$0xff] }
  0x93   :  { %v441_v45 = vld [vmem:[#allocation5 + $0x880] sm:$0xff]  ;;  %861 = vmatpush.msrb.mxu3 %v641_v44  ;;  %v394_v44 = vld [vmem:[#allocation5 + $0x708] sm:$0xff] }
  0x94   :  { %v505_v46 = vld [vmem:[#allocation5 + $0xa80] sm:$0xff]  ;;  %803 = vmatpush.msrb.mxu0 %v441_v45  ;;  %v194_v45 = vld [vmem:[#allocation5 + $0xc8] sm:$0xff] }
  0x95   :  { %v569_v47 = vld [vmem:[#allocation5 + $0xc80] sm:$0xff]  ;;  %823 = vmatpush.msrb.mxu1 %v505_v46  ;;  %v258_v46 = vld [vmem:[#allocation5 + $0x2c8] sm:$0xff] }
  0x96   :  { %v637_v48 = vld [vmem:[#allocation5 + $0xea0] sm:$0xff]  ;;  %843 = vmatpush.msrb.mxu2 %v569_v47  ;;  %v322_v47 = vld [vmem:[#allocation5 + $0x4c8] sm:$0xff] }
  0x97   :  { %v437_v49 = vld [vmem:[#allocation5 + $0x860] sm:$0xff]  ;;  %862 = vmatpush.msrb.mxu3 %v637_v48  ;;  %v390_v48 = vld [vmem:[#allocation5 + $0x6e8] sm:$0xff] }
  0x98   :  { %v501_v50 = vld [vmem:[#allocation5 + $0xa60] sm:$0xff]  ;;  %804 = vmatpush.msrb.mxu0 %v437_v49  ;;  %v190_v49 = vld [vmem:[#allocation5 + $0xa8] sm:$0xff] }
  0x99   :  { %v565_v51 = vld [vmem:[#allocation5 + $0xc60] sm:$0xff]  ;;  %824 = vmatpush.msrb.mxu1 %v501_v50  ;;  %v254_v50 = vld [vmem:[#allocation5 + $0x2a8] sm:$0xff] }
  0x9a   :  { %v633_v52 = vld [vmem:[#allocation5 + $0xe80] sm:$0xff]  ;;  %844 = vmatpush.msrb.mxu2 %v565_v51  ;;  %v318_v51 = vld [vmem:[#allocation5 + $0x4a8] sm:$0xff] }
  0x9b   :  { %v433_v53 = vld [vmem:[#allocation5 + $0x840] sm:$0xff]  ;;  %863 = vmatpush.msrb.mxu3 %v633_v52  ;;  %v386_v52 = vld [vmem:[#allocation5 + $0x6c8] sm:$0xff] }
  0x9c   :  { %v497_v54 = vld [vmem:[#allocation5 + $0xa40] sm:$0xff]  ;;  %805 = vmatpush.msrb.mxu0 %v433_v53  ;;  %v186_v53 = vld [vmem:[#allocation5 + $0x88] sm:$0xff] }
  0x9d   :  { %v561_v55 = vld [vmem:[#allocation5 + $0xc40] sm:$0xff]  ;;  %825 = vmatpush.msrb.mxu1 %v497_v54  ;;  %v250_v54 = vld [vmem:[#allocation5 + $0x288] sm:$0xff] }
  0x9e   :  { %v629_v56 = vld [vmem:[#allocation5 + $0xe60] sm:$0xff]  ;;  %845 = vmatpush.msrb.mxu2 %v561_v55  ;;  %v314_v55 = vld [vmem:[#allocation5 + $0x488] sm:$0xff] }
  0x9f   :  { %v429_v57 = vld [vmem:[#allocation5 + $0x820] sm:$0xff]  ;;  %864 = vmatpush.msrb.mxu3 %v629_v56  ;;  %v382_v56 = vld [vmem:[#allocation5 + $0x6a8] sm:$0xff] }
  0xa0   :  { %v493_v58 = vld [vmem:[#allocation5 + $0xa20] sm:$0xff]  ;;  %806 = vmatpush.msrb.mxu0 %v429_v57  ;;  %v182_v57 = vld [vmem:[#allocation5 + $0x68] sm:$0xff] }
  0xa1   :  { %v557_v59 = vld [vmem:[#allocation5 + $0xc20] sm:$0xff]  ;;  %826 = vmatpush.msrb.mxu1 %v493_v58  ;;  %v246_v58 = vld [vmem:[#allocation5 + $0x268] sm:$0xff] }
  0xa2   :  { %v625_v60 = vld [vmem:[#allocation5 + $0xe40] sm:$0xff]  ;;  %846 = vmatpush.msrb.mxu2 %v557_v59  ;;  %v310_v59 = vld [vmem:[#allocation5 + $0x468] sm:$0xff] }
  0xa3   :  { %v425_v61 = vld [vmem:[#allocation5 + $0x800] sm:$0xff]  ;;  %865 = vmatpush.msrb.mxu3 %v625_v60  ;;  %v378_v60 = vld [vmem:[#allocation5 + $0x688] sm:$0xff] }
  0xa4   :  { %v489_v62 = vld [vmem:[#allocation5 + $0xa00] sm:$0xff]  ;;  %807 = vmatpush.msrb.mxu0 %v425_v61  ;;  %v178_v61 = vld [vmem:[#allocation5 + $0x48] sm:$0xff] }
  0xa5   :  { %v553_v63 = vld [vmem:[#allocation5 + $0xc00] sm:$0xff]  ;;  %827 = vmatpush.msrb.mxu1 %v489_v62  ;;  %808 = vmatmul.f32.vlgmr.msrb.gmra.mxu0 %v2227_v26  ;;  %v242_v62 = vld [vmem:[#allocation5 + $0x248] sm:$0xff] }
  0xa6   :  { %v621_v0 = vld [vmem:[#allocation5 + $0xe20] sm:$0xff]  ;;  %847 = vmatpush.msrb.mxu2 %v553_v63  ;;  %872 = vmatpush.msra.mxu0 %v230_v4  ;;  %v306_v63 = vld [vmem:[#allocation5 + $0x448] sm:$0xff] }
  0xa7   :  { %866 = vmatpush.msrb.mxu3 %v621_v0  ;;  %v617_v7 = vld [vmem:[#allocation5 + $0xe00] sm:$0xff]  ;;  %892 = vmatpush.msra.mxu1 %v294_v5  ;;  %v374_v0 = vld [vmem:[#allocation5 + $0x668] sm:$0xff] }
  0xa8   :  { %v2222_v9 = vld.sshfl [vmem:[#allocation1 + $0x18] sm:$0xff pattern:$0x73625140]  ;;  %912 = vmatpush.msra.mxu2 %v358_v6  ;;  %873 = vmatpush.msra.mxu0 %v226_v8  ;;  %v174_v4 = vld [vmem:[#allocation5 + $0x28] sm:$0xff] }
  0xa9   :  { %867 = vmatpush.msrb.mxu3 %v617_v7  ;;  %893 = vmatpush.msra.mxu1 %v290_v10  ;;  %v2230_v27 = vld.sshfl [vmem:[#allocation1 + $0x38] sm:$0xff pattern:$0x73625140]  ;;  %v238_v5 = vld [vmem:[#allocation5 + $0x228] sm:$0xff] }
  0xaa   :  { %788 = vmatmul.f32.vlgmr.msra.gmra.mxu3 %v2222_v9  ;;  %913 = vmatpush.msra.mxu2 %v354_v11  ;;  %v302_v6 = vld [vmem:[#allocation5 + $0x428] sm:$0xff] }
  0xab   :  { %932 = vmatpush.msra.mxu3 %v422_v12  ;;  %874 = vmatpush.msra.mxu0 %v222_v13  ;;  %v370_v7 = vld [vmem:[#allocation5 + $0x648] sm:$0xff] }
  0xac   :  { %894 = vmatpush.msra.mxu1 %v286_v14  ;;  %914 = vmatpush.msra.mxu2 %v350_v15  ;;  %v170_v8 = vld [vmem:[#allocation5 + $0x8] sm:$0xff] }
  0xad   :  { %933 = vmatpush.msra.mxu3 %v418_v16  ;;  %875 = vmatpush.msra.mxu0 %v218_v17  ;;  %v234_v10 = vld [vmem:[#allocation5 + $0x208] sm:$0xff] }
  0xae   :  { %895 = vmatpush.msra.mxu1 %v282_v18  ;;  %915 = vmatpush.msra.mxu2 %v346_v19  ;;  %v298_v11 = vld [vmem:[#allocation5 + $0x408] sm:$0xff] }
  0xaf   :  { %934 = vmatpush.msra.mxu3 %v414_v20  ;;  %848 = vmatmul.f32.vlgmr.msrb.gmra.mxu2 %v2225_v21  ;;  %v366_v12 = vld [vmem:[#allocation5 + $0x628] sm:$0xff] }
  0xb0   :  { %876 = vmatpush.msra.mxu0 %v214_v22  ;;  %896 = vmatpush.msra.mxu1 %v278_v23  ;;  %v486_v13 = vld [vmem:[#allocation5 + $0x9e8] sm:$0xff] }
  0xb1   :  { %916 = vmatpush.msra.mxu2 %v342_v24  ;;  %935 = vmatpush.msra.mxu3 %v410_v25  ;;  %v550_v14 = vld [vmem:[#allocation5 + $0xbe8] sm:$0xff] }
  0xb2   :  { %868 = vmatmul.f32.vlgmr.msrb.gmra.mxu3 %v2230_v27  ;;  %877 = vmatpush.msra.mxu0 %v210_v28  ;;  %v614_v15 = vld [vmem:[#allocation5 + $0xde8] sm:$0xff] }
  0xb3   :  { %897 = vmatpush.msra.mxu1 %v274_v29  ;;  %917 = vmatpush.msra.mxu2 %v338_v30  ;;  %v362_v16 = vld [vmem:[#allocation5 + $0x608] sm:$0xff] }
  0xb4   :  { %936 = vmatpush.msra.mxu3 %v406_v31  ;;  %828 = vmatmul.f32.vlgmr.msrb.gmra.mxu1 %v2233_v32  ;;  %v482_v17 = vld [vmem:[#allocation5 + $0x9c8] sm:$0xff] }
  0xb5   :  { %878 = vmatpush.msra.mxu0 %v206_v33  ;;  %898 = vmatpush.msra.mxu1 %v270_v34  ;;  %v546_v18 = vld [vmem:[#allocation5 + $0xbc8] sm:$0xff] }
  0xb6   :  { %918 = vmatpush.msra.mxu2 %v334_v35  ;;  %937 = vmatpush.msra.mxu3 %v402_v36  ;;  %v610_v19 = vld [vmem:[#allocation5 + $0xdc8] sm:$0xff] }
  0xb7   :  { %879 = vmatpush.msra.mxu0 %v202_v37  ;;  %899 = vmatpush.msra.mxu1 %v266_v38  ;;  %v678_v20 = vld [vmem:[#allocation5 + $0xfe8] sm:$0xff] }
  0xb8   :  { %919 = vmatpush.msra.mxu2 %v330_v39  ;;  %938 = vmatpush.msra.mxu3 %v398_v40  ;;  %v478_v22 = vld [vmem:[#allocation5 + $0x9a8] sm:$0xff] }
  0xb9   :  { %880 = vmatpush.msra.mxu0 %v198_v41  ;;  %900 = vmatpush.msra.mxu1 %v262_v42  ;;  %v542_v23 = vld [vmem:[#allocation5 + $0xba8] sm:$0xff] }
  0xba   :  { %920 = vmatpush.msra.mxu2 %v326_v43  ;;  %939 = vmatpush.msra.mxu3 %v394_v44  ;;  %v606_v24 = vld [vmem:[#allocation5 + $0xda8] sm:$0xff] }
  0xbb   :  { %881 = vmatpush.msra.mxu0 %v194_v45  ;;  %901 = vmatpush.msra.mxu1 %v258_v46  ;;  %v674_v25 = vld [vmem:[#allocation5 + $0xfc8] sm:$0xff] }
  0xbc   :  { %921 = vmatpush.msra.mxu2 %v322_v47  ;;  %940 = vmatpush.msra.mxu3 %v390_v48  ;;  %v474_v28 = vld [vmem:[#allocation5 + $0x988] sm:$0xff] }
  0xbd   :  { %882 = vmatpush.msra.mxu0 %v190_v49  ;;  %902 = vmatpush.msra.mxu1 %v254_v50  ;;  %v538_v29 = vld [vmem:[#allocation5 + $0xb88] sm:$0xff] }
  0xbe   :  { %922 = vmatpush.msra.mxu2 %v318_v51  ;;  %941 = vmatpush.msra.mxu3 %v386_v52  ;;  %v602_v30 = vld [vmem:[#allocation5 + $0xd88] sm:$0xff] }
  0xbf   :  { %883 = vmatpush.msra.mxu0 %v186_v53  ;;  %903 = vmatpush.msra.mxu1 %v250_v54  ;;  %v670_v31 = vld [vmem:[#allocation5 + $0xfa8] sm:$0xff] }
  0xc0   :  { %923 = vmatpush.msra.mxu2 %v314_v55  ;;  %942 = vmatpush.msra.mxu3 %v382_v56  ;;  %v470_v33 = vld [vmem:[#allocation5 + $0x968] sm:$0xff] }
  0xc1   :  { %884 = vmatpush.msra.mxu0 %v182_v57  ;;  %904 = vmatpush.msra.mxu1 %v246_v58  ;;  %v534_v34 = vld [vmem:[#allocation5 + $0xb68] sm:$0xff] }
  0xc2   :  { %924 = vmatpush.msra.mxu2 %v310_v59  ;;  %943 = vmatpush.msra.mxu3 %v378_v60  ;;  %v598_v35 = vld [vmem:[#allocation5 + $0xd68] sm:$0xff] }
  0xc3   :  { %885 = vmatpush.msra.mxu0 %v178_v61  ;;  %905 = vmatpush.msra.mxu1 %v242_v62  ;;  %v666_v36 = vld [vmem:[#allocation5 + $0xf88] sm:$0xff] }
  0xc4   :  { %925 = vmatpush.msra.mxu2 %v306_v63  ;;  %944 = vmatpush.msra.mxu3 %v374_v0  ;;  %v466_v37 = vld [vmem:[#allocation5 + $0x948] sm:$0xff] }
  0xc5   :  { %886 = vmatpush.msra.mxu0 %v174_v4  ;;  %906 = vmatpush.msra.mxu1 %v238_v5  ;;  %v530_v38 = vld [vmem:[#allocation5 + $0xb48] sm:$0xff] }
  0xc6   :  { %926 = vmatpush.msra.mxu2 %v302_v6  ;;  %945 = vmatpush.msra.mxu3 %v370_v7  ;;  %v594_v39 = vld [vmem:[#allocation5 + $0xd48] sm:$0xff] }
  0xc7   :  { %887 = vmatpush.msra.mxu0 %v170_v8  ;;  %907 = vmatpush.msra.mxu1 %v234_v10  ;;  %v662_v40 = vld [vmem:[#allocation5 + $0xf68] sm:$0xff] }
  0xc8   :  { %927 = vmatpush.msra.mxu2 %v298_v11  ;;  %946 = vmatpush.msra.mxu3 %v366_v12  ;;  %v462_v41 = vld [vmem:[#allocation5 + $0x928] sm:$0xff] }
  0xc9   :  { %952 = vmatpush.msrb.mxu0 %v486_v13  ;;  %972 = vmatpush.msrb.mxu1 %v550_v14  ;;  %v526_v42 = vld [vmem:[#allocation5 + $0xb28] sm:$0xff] }
  0xca   :  { %992 = vmatpush.msrb.mxu2 %v614_v15  ;;  %947 = vmatpush.msra.mxu3 %v362_v16  ;;  %v590_v43 = vld [vmem:[#allocation5 + $0xd28] sm:$0xff] }
  0xcb   :  { %953 = vmatpush.msrb.mxu0 %v482_v17  ;;  %973 = vmatpush.msrb.mxu1 %v546_v18  ;;  %v658_v44 = vld [vmem:[#allocation5 + $0xf48] sm:$0xff] }
  0xcc   :  { %993 = vmatpush.msrb.mxu2 %v610_v19  ;;  %1012 = vmatpush.msrb.mxu3 %v678_v20  ;;  %v458_v45 = vld [vmem:[#allocation5 + $0x908] sm:$0xff] }
  0xcd   :  { %954 = vmatpush.msrb.mxu0 %v478_v22  ;;  %974 = vmatpush.msrb.mxu1 %v542_v23  ;;  %v522_v46 = vld [vmem:[#allocation5 + $0xb08] sm:$0xff]  ;;  %v231_v22 = vld [vmem:[#allocation5 + $0x1f0] sm:$0xff] }
  0xce   :  { %994 = vmatpush.msrb.mxu2 %v606_v24  ;;  %1013 = vmatpush.msrb.mxu3 %v674_v25  ;;  %v586_v47 = vld [vmem:[#allocation5 + $0xd08] sm:$0xff]  ;;  %v295_v23 = vld [vmem:[#allocation5 + $0x3f0] sm:$0xff] }
  0xcf   :  { %955 = vmatpush.msrb.mxu0 %v474_v28  ;;  %975 = vmatpush.msrb.mxu1 %v538_v29  ;;  %v654_v48 = vld [vmem:[#allocation5 + $0xf28] sm:$0xff]  ;;  %v359_v24 = vld [vmem:[#allocation5 + $0x5f0] sm:$0xff] }
  0xd0   :  { %995 = vmatpush.msrb.mxu2 %v602_v30  ;;  %1014 = vmatpush.msrb.mxu3 %v670_v31  ;;  %v454_v49 = vld [vmem:[#allocation5 + $0x8e8] sm:$0xff]  ;;  %v227_v28 = vld [vmem:[#allocation5 + $0x1d0] sm:$0xff] }
  0xd1   :  { %956 = vmatpush.msrb.mxu0 %v470_v33  ;;  %976 = vmatpush.msrb.mxu1 %v534_v34  ;;  %v518_v50 = vld [vmem:[#allocation5 + $0xae8] sm:$0xff]  ;;  %v291_v29 = vld [vmem:[#allocation5 + $0x3d0] sm:$0xff] }
  0xd2   :  { %996 = vmatpush.msrb.mxu2 %v598_v35  ;;  %1015 = vmatpush.msrb.mxu3 %v666_v36  ;;  %v582_v51 = vld [vmem:[#allocation5 + $0xce8] sm:$0xff]  ;;  %v355_v30 = vld [vmem:[#allocation5 + $0x5d0] sm:$0xff] }
  0xd3   :  { %957 = vmatpush.msrb.mxu0 %v466_v37  ;;  %977 = vmatpush.msrb.mxu1 %v530_v38  ;;  %v650_v52 = vld [vmem:[#allocation5 + $0xf08] sm:$0xff]  ;;  %v423_v31 = vld [vmem:[#allocation5 + $0x7f0] sm:$0xff] }
  0xd4   :  { %997 = vmatpush.msrb.mxu2 %v594_v39  ;;  %1016 = vmatpush.msrb.mxu3 %v662_v40  ;;  %v450_v53 = vld [vmem:[#allocation5 + $0x8c8] sm:$0xff]  ;;  %v223_v33 = vld [vmem:[#allocation5 + $0x1b0] sm:$0xff] }
  0xd5   :  { %958 = vmatpush.msrb.mxu0 %v462_v41  ;;  %978 = vmatpush.msrb.mxu1 %v526_v42  ;;  %v514_v54 = vld [vmem:[#allocation5 + $0xac8] sm:$0xff]  ;;  %v287_v34 = vld [vmem:[#allocation5 + $0x3b0] sm:$0xff] }
  0xd6   :  { %998 = vmatpush.msrb.mxu2 %v590_v43  ;;  %1017 = vmatpush.msrb.mxu3 %v658_v44  ;;  %v578_v55 = vld [vmem:[#allocation5 + $0xcc8] sm:$0xff]  ;;  %v419_v35 = vld [vmem:[#allocation5 + $0x7d0] sm:$0xff] }
  0xd7   :  { %959 = vmatpush.msrb.mxu0 %v458_v45  ;;  %979 = vmatpush.msrb.mxu1 %v522_v46  ;;  %v646_v56 = vld [vmem:[#allocation5 + $0xee8] sm:$0xff]  ;;  %v283_v36 = vld [vmem:[#allocation5 + $0x390] sm:$0xff] }
  0xd8   :  { %999 = vmatpush.msrb.mxu2 %v586_v47  ;;  %1018 = vmatpush.msrb.mxu3 %v654_v48  ;;  %v446_v57 = vld [vmem:[#allocation5 + $0x8a8] sm:$0xff]  ;;  %v347_v37 = vld [vmem:[#allocation5 + $0x590] sm:$0xff] }
  0xd9   :  { %960 = vmatpush.msrb.mxu0 %v454_v49  ;;  %980 = vmatpush.msrb.mxu1 %v518_v50  ;;  %v510_v58 = vld [vmem:[#allocation5 + $0xaa8] sm:$0xff]  ;;  %v415_v38 = vld [vmem:[#allocation5 + $0x7b0] sm:$0xff] }
  0xda   :  { %1000 = vmatpush.msrb.mxu2 %v582_v51  ;;  %1019 = vmatpush.msrb.mxu3 %v650_v52  ;;  %v574_v59 = vld [vmem:[#allocation5 + $0xca8] sm:$0xff]  ;;  %v215_v39 = vld [vmem:[#allocation5 + $0x170] sm:$0xff] }
  0xdb   :  { %961 = vmatpush.msrb.mxu0 %v450_v53  ;;  %981 = vmatpush.msrb.mxu1 %v514_v54  ;;  %v642_v60 = vld [vmem:[#allocation5 + $0xec8] sm:$0xff]  ;;  %v279_v40 = vld [vmem:[#allocation5 + $0x370] sm:$0xff] }
  0xdc   :  { %1001 = vmatpush.msrb.mxu2 %v578_v55  ;;  %1020 = vmatpush.msrb.mxu3 %v646_v56  ;;  %v442_v61 = vld [vmem:[#allocation5 + $0x888] sm:$0xff]  ;;  %v343_v41 = vld [vmem:[#allocation5 + $0x570] sm:$0xff] }
  0xdd   :  { %v506_v62 = vld [vmem:[#allocation5 + $0xa88] sm:$0xff]  ;;  %962 = vmatpush.msrb.mxu0 %v446_v57  ;;  %982 = vmatpush.msrb.mxu1 %v510_v58  ;;  %v411_v42 = vld [vmem:[#allocation5 + $0x790] sm:$0xff] }
  0xde   :  { %v570_v63 = vld [vmem:[#allocation5 + $0xc88] sm:$0xff]  ;;  %1002 = vmatpush.msrb.mxu2 %v574_v59  ;;  %1021 = vmatpush.msrb.mxu3 %v642_v60  ;;  %v211_v43 = vld [vmem:[#allocation5 + $0x150] sm:$0xff] }
  0xdf   :  { %v638_v0 = vld [vmem:[#allocation5 + $0xea8] sm:$0xff]  ;;  %963 = vmatpush.msrb.mxu0 %v442_v61  ;;  %983 = vmatpush.msrb.mxu1 %v506_v62  ;;  %v275_v44 = vld [vmem:[#allocation5 + $0x350] sm:$0xff] }
  0xe0   :  { %v438_v4 = vld [vmem:[#allocation5 + $0x868] sm:$0xff]  ;;  %1003 = vmatpush.msrb.mxu2 %v570_v63  ;;  %1022 = vmatpush.msrb.mxu3 %v638_v0  ;;  %v339_v45 = vld [vmem:[#allocation5 + $0x550] sm:$0xff] }
  0xe1   :  { %v502_v5 = vld [vmem:[#allocation5 + $0xa68] sm:$0xff]  ;;  %964 = vmatpush.msrb.mxu0 %v438_v4  ;;  %908 = vmatmul.f32.vlgmr.msra.gmra.mxu1 %v2215_v2  ;;  %v219_v2 = vld [vmem:[#allocation5 + $0x190] sm:$0xff] }
  0xe2   :  { %v566_v6 = vld [vmem:[#allocation5 + $0xc68] sm:$0xff]  ;;  %984 = vmatpush.msrb.mxu1 %v502_v5  ;;  %888 = vmatmul.f32.vlgmr.msra.gmra.mxu0 %v2213_v1  ;;  %v351_v1 = vld [vmem:[#allocation5 + $0x5b0] sm:$0xff] }
  0xe3   :  { %v634_v7 = vld [vmem:[#allocation5 + $0xe88] sm:$0xff]  ;;  %1004 = vmatpush.msrb.mxu2 %v566_v6  ;;  %948 = vmatmul.f32.vlgmr.msra.gmra.mxu3 %v2222_v9  ;;  %v407_v46 = vld [vmem:[#allocation5 + $0x770] sm:$0xff] }
  0xe4   :  { %v434_v8 = vld [vmem:[#allocation5 + $0x848] sm:$0xff]  ;;  %1023 = vmatpush.msrb.mxu3 %v634_v7  ;;  %928 = vmatmul.f32.vlgmr.msra.gmra.mxu2 %v2217_v3  ;;  %v207_v47 = vld [vmem:[#allocation5 + $0x130] sm:$0xff] }
  0xe5   :  { %v498_v10 = vld [vmem:[#allocation5 + $0xa48] sm:$0xff]  ;;  %965 = vmatpush.msrb.mxu0 %v434_v8  ;;  %v271_v48 = vld [vmem:[#allocation5 + $0x330] sm:$0xff] }
  0xe6   :  { %v562_v11 = vld [vmem:[#allocation5 + $0xc48] sm:$0xff]  ;;  %985 = vmatpush.msrb.mxu1 %v498_v10  ;;  %v335_v49 = vld [vmem:[#allocation5 + $0x530] sm:$0xff] }
  0xe7   :  { %v630_v12 = vld [vmem:[#allocation5 + $0xe68] sm:$0xff]  ;;  %1005 = vmatpush.msrb.mxu2 %v562_v11  ;;  %v403_v50 = vld [vmem:[#allocation5 + $0x750] sm:$0xff] }
  0xe8   :  { %v430_v13 = vld [vmem:[#allocation5 + $0x828] sm:$0xff]  ;;  %1024 = vmatpush.msrb.mxu3 %v630_v12  ;;  %v203_v51 = vld [vmem:[#allocation5 + $0x110] sm:$0xff] }
  0xe9   :  { %v494_v14 = vld [vmem:[#allocation5 + $0xa28] sm:$0xff]  ;;  %966 = vmatpush.msrb.mxu0 %v430_v13  ;;  %v267_v52 = vld [vmem:[#allocation5 + $0x310] sm:$0xff] }
  0xea   :  { %v558_v15 = vld [vmem:[#allocation5 + $0xc28] sm:$0xff]  ;;  %986 = vmatpush.msrb.mxu1 %v494_v14  ;;  %v331_v53 = vld [vmem:[#allocation5 + $0x510] sm:$0xff] }
  0xeb   :  { %v626_v16 = vld [vmem:[#allocation5 + $0xe48] sm:$0xff]  ;;  %1006 = vmatpush.msrb.mxu2 %v558_v15  ;;  %v399_v54 = vld [vmem:[#allocation5 + $0x730] sm:$0xff] }
  0xec   :  { %v426_v17 = vld [vmem:[#allocation5 + $0x808] sm:$0xff]  ;;  %1025 = vmatpush.msrb.mxu3 %v626_v16  ;;  %v199_v55 = vld [vmem:[#allocation5 + $0xf0] sm:$0xff] }
  0xed   :  { %v490_v18 = vld [vmem:[#allocation5 + $0xa08] sm:$0xff]  ;;  %967 = vmatpush.msrb.mxu0 %v426_v17  ;;  %v263_v56 = vld [vmem:[#allocation5 + $0x2f0] sm:$0xff] }
  0xee   :  { %v554_v19 = vld [vmem:[#allocation5 + $0xc08] sm:$0xff]  ;;  %987 = vmatpush.msrb.mxu1 %v490_v18  ;;  %968 = vmatmul.f32.vlgmr.msrb.gmra.mxu0 %v2227_v26  ;;  %v327_v57 = vld [vmem:[#allocation5 + $0x4f0] sm:$0xff] }
  0xef   :  { %v622_v20 = vld [vmem:[#allocation5 + $0xe28] sm:$0xff]  ;;  %1007 = vmatpush.msrb.mxu2 %v554_v19  ;;  %1032 = vmatpush.msra.mxu0 %v231_v22  ;;  %v395_v58 = vld [vmem:[#allocation5 + $0x710] sm:$0xff] }
  0xf0   :  { %1026 = vmatpush.msrb.mxu3 %v622_v20  ;;  %v618_v25 = vld [vmem:[#allocation5 + $0xe08] sm:$0xff]  ;;  %1052 = vmatpush.msra.mxu1 %v295_v23  ;;  %v195_v59 = vld [vmem:[#allocation5 + $0xd0] sm:$0xff] }
  0xf1   :  { %1072 = vmatpush.msra.mxu2 %v359_v24  ;;  %1033 = vmatpush.msra.mxu0 %v227_v28  ;;  %v259_v60 = vld [vmem:[#allocation5 + $0x2d0] sm:$0xff] }
  0xf2   :  { %1027 = vmatpush.msrb.mxu3 %v618_v25  ;;  %1053 = vmatpush.msra.mxu1 %v291_v29  ;;  %v323_v61 = vld [vmem:[#allocation5 + $0x4d0] sm:$0xff] }
  0xf3   :  { %1073 = vmatpush.msra.mxu2 %v355_v30  ;;  %1034 = vmatpush.msra.mxu0 %v223_v33  ;;  %v391_v62 = vld [vmem:[#allocation5 + $0x6f0] sm:$0xff] }
  0xf4   :  { %1092 = vmatpush.msra.mxu3 %v423_v31  ;;  %1054 = vmatpush.msra.mxu1 %v287_v34  ;;  %v191_v63 = vld [vmem:[#allocation5 + $0xb0] sm:$0xff] }
  0xf5   :  { %1074 = vmatpush.msra.mxu2 %v351_v1  ;;  %1035 = vmatpush.msra.mxu0 %v219_v2  ;;  %v255_v0 = vld [vmem:[#allocation5 + $0x2b0] sm:$0xff] }
  0xf6   :  { %1093 = vmatpush.msra.mxu3 %v419_v35  ;;  %1055 = vmatpush.msra.mxu1 %v283_v36  ;;  %v319_v4 = vld [vmem:[#allocation5 + $0x4b0] sm:$0xff] }
  0xf7   :  { %1075 = vmatpush.msra.mxu2 %v347_v37  ;;  %1036 = vmatpush.msra.mxu0 %v215_v39  ;;  %v387_v5 = vld [vmem:[#allocation5 + $0x6d0] sm:$0xff] }
  0xf8   :  { %1094 = vmatpush.msra.mxu3 %v415_v38  ;;  %1008 = vmatmul.f32.vlgmr.msrb.gmra.mxu2 %v2225_v21  ;;  %v187_v6 = vld [vmem:[#allocation5 + $0x90] sm:$0xff] }
  0xf9   :  { %1056 = vmatpush.msra.mxu1 %v279_v40  ;;  %1076 = vmatpush.msra.mxu2 %v343_v41  ;;  %v251_v7 = vld [vmem:[#allocation5 + $0x290] sm:$0xff] }
  0xfa   :  { %1095 = vmatpush.msra.mxu3 %v411_v42  ;;  %1037 = vmatpush.msra.mxu0 %v211_v43  ;;  %v315_v8 = vld [vmem:[#allocation5 + $0x490] sm:$0xff] }
  0xfb   :  { %1028 = vmatmul.f32.vlgmr.msrb.gmra.mxu3 %v2230_v27  ;;  %1057 = vmatpush.msra.mxu1 %v275_v44  ;;  %v383_v10 = vld [vmem:[#allocation5 + $0x6b0] sm:$0xff] }
  0xfc   :  { %1077 = vmatpush.msra.mxu2 %v339_v45  ;;  %1096 = vmatpush.msra.mxu3 %v407_v46  ;;  %v183_v11 = vld [vmem:[#allocation5 + $0x70] sm:$0xff] }
  0xfd   :  { %988 = vmatmul.f32.vlgmr.msrb.gmra.mxu1 %v2233_v32  ;;  %1038 = vmatpush.msra.mxu0 %v207_v47  ;;  %v247_v12 = vld [vmem:[#allocation5 + $0x270] sm:$0xff] }
  0xfe   :  { %1058 = vmatpush.msra.mxu1 %v271_v48  ;;  %1078 = vmatpush.msra.mxu2 %v335_v49  ;;  %v311_v13 = vld [vmem:[#allocation5 + $0x470] sm:$0xff] }
  0xff   :  { %1097 = vmatpush.msra.mxu3 %v403_v50  ;;  %1039 = vmatpush.msra.mxu0 %v203_v51  ;;  %v379_v14 = vld [vmem:[#allocation5 + $0x690] sm:$0xff] }
 0x100   :  { %1059 = vmatpush.msra.mxu1 %v267_v52  ;;  %1079 = vmatpush.msra.mxu2 %v331_v53  ;;  %v179_v15 = vld [vmem:[#allocation5 + $0x50] sm:$0xff] }
 0x101   :  { %1098 = vmatpush.msra.mxu3 %v399_v54  ;;  %1040 = vmatpush.msra.mxu0 %v199_v55  ;;  %v243_v16 = vld [vmem:[#allocation5 + $0x250] sm:$0xff] }
 0x102   :  { %1060 = vmatpush.msra.mxu1 %v263_v56  ;;  %1080 = vmatpush.msra.mxu2 %v327_v57  ;;  %v307_v17 = vld [vmem:[#allocation5 + $0x450] sm:$0xff] }
 0x103   :  { %1099 = vmatpush.msra.mxu3 %v395_v58  ;;  %1041 = vmatpush.msra.mxu0 %v195_v59  ;;  %v375_v18 = vld [vmem:[#allocation5 + $0x670] sm:$0xff] }
 0x104   :  { %1061 = vmatpush.msra.mxu1 %v259_v60  ;;  %1081 = vmatpush.msra.mxu2 %v323_v61  ;;  %v175_v19 = vld [vmem:[#allocation5 + $0x30] sm:$0xff] }
 0x105   :  { %1100 = vmatpush.msra.mxu3 %v391_v62  ;;  %1042 = vmatpush.msra.mxu0 %v191_v63  ;;  %v239_v20 = vld [vmem:[#allocation5 + $0x230] sm:$0xff] }
 0x106   :  { %1062 = vmatpush.msra.mxu1 %v255_v0  ;;  %1082 = vmatpush.msra.mxu2 %v319_v4  ;;  %v303_v22 = vld [vmem:[#allocation5 + $0x430] sm:$0xff] }
 0x107   :  { %1101 = vmatpush.msra.mxu3 %v387_v5  ;;  %1043 = vmatpush.msra.mxu0 %v187_v6  ;;  %v371_v23 = vld [vmem:[#allocation5 + $0x650] sm:$0xff] }
 0x108   :  { %1063 = vmatpush.msra.mxu1 %v251_v7  ;;  %1083 = vmatpush.msra.mxu2 %v315_v8  ;;  %v171_v24 = vld [vmem:[#allocation5 + $0x10] sm:$0xff] }
 0x109   :  { %1102 = vmatpush.msra.mxu3 %v383_v10  ;;  %1044 = vmatpush.msra.mxu0 %v183_v11  ;;  %v235_v25 = vld [vmem:[#allocation5 + $0x210] sm:$0xff] }
 0x10a   :  { %1064 = vmatpush.msra.mxu1 %v247_v12  ;;  %1084 = vmatpush.msra.mxu2 %v311_v13  ;;  %v299_v28 = vld [vmem:[#allocation5 + $0x410] sm:$0xff] }
 0x10b   :  { %1103 = vmatpush.msra.mxu3 %v379_v14  ;;  %1045 = vmatpush.msra.mxu0 %v179_v15  ;;  %v367_v29 = vld [vmem:[#allocation5 + $0x630] sm:$0xff] }
 0x10c   :  { %1065 = vmatpush.msra.mxu1 %v243_v16  ;;  %1085 = vmatpush.msra.mxu2 %v307_v17  ;;  %v487_v30 = vld [vmem:[#allocation5 + $0x9f0] sm:$0xff] }
 0x10d   :  { %1104 = vmatpush.msra.mxu3 %v375_v18  ;;  %1046 = vmatpush.msra.mxu0 %v175_v19  ;;  %v551_v31 = vld [vmem:[#allocation5 + $0xbf0] sm:$0xff] }
 0x10e   :  { %1066 = vmatpush.msra.mxu1 %v239_v20  ;;  %1086 = vmatpush.msra.mxu2 %v303_v22  ;;  %v615_v33 = vld [vmem:[#allocation5 + $0xdf0] sm:$0xff] }
 0x10f   :  { %1105 = vmatpush.msra.mxu3 %v371_v23  ;;  %1047 = vmatpush.msra.mxu0 %v171_v24  ;;  %v363_v34 = vld [vmem:[#allocation5 + $0x610] sm:$0xff] }
 0x110   :  { %1067 = vmatpush.msra.mxu1 %v235_v25  ;;  %1087 = vmatpush.msra.mxu2 %v299_v28  ;;  %v483_v1 = vld [vmem:[#allocation5 + $0x9d0] sm:$0xff]  ;;  %v2246_v25 = vld.sshfl [vmem:[#allocation1] sm:$0xff pattern:$0x73625140] }
 0x111   :  { %1106 = vmatpush.msra.mxu3 %v367_v29  ;;  %v547_v35 = vld [vmem:[#allocation5 + $0xbd0] sm:$0xff]  ;;  %1112 = vmatpush.msrb.mxu0 %v487_v30 }
 0x112   :  { %1132 = vmatpush.msrb.mxu1 %v551_v31  ;;  %v611_v2 = vld [vmem:[#allocation5 + $0xdd0] sm:$0xff]  ;;  %1152 = vmatpush.msrb.mxu2 %v615_v33 }
 0x113   :  { %v679_v36 = vld [vmem:[#allocation5 + $0xff0] sm:$0xff]  ;;  %1107 = vmatpush.msra.mxu3 %v363_v34  ;;  %1113 = vmatpush.msrb.mxu0 %v483_v1 }
 0x114   :  { %v479_v37 = vld [vmem:[#allocation5 + $0x9b0] sm:$0xff]  ;;  %1133 = vmatpush.msrb.mxu1 %v547_v35  ;;  %1153 = vmatpush.msrb.mxu2 %v611_v2 }
 0x115   :  { %v543_v38 = vld [vmem:[#allocation5 + $0xbb0] sm:$0xff]  ;;  %1172 = vmatpush.msrb.mxu3 %v679_v36  ;;  %1114 = vmatpush.msrb.mxu0 %v479_v37  ;;  %v296_v36 = vld [vmem:[#allocation5 + $0x3f8] sm:$0xff] }
 0x116   :  { %v607_v39 = vld [vmem:[#allocation5 + $0xdb0] sm:$0xff]  ;;  %1134 = vmatpush.msrb.mxu1 %v543_v38  ;;  %1088 = vmatmul.f32.vlgmr.msra.gmra.mxu2 %v2217_v3  ;;  %v360_v37 = vld [vmem:[#allocation5 + $0x5f8] sm:$0xff] }
 0x117   :  { %v675_v40 = vld [vmem:[#allocation5 + $0xfd0] sm:$0xff]  ;;  %1154 = vmatpush.msrb.mxu2 %v607_v39  ;;  %1048 = vmatmul.f32.vlgmr.msra.gmra.mxu0 %v2246_v25  ;;  %v228_v39 = vld [vmem:[#allocation5 + $0x1d8] sm:$0xff] }
 0x118   :  { %v475_v41 = vld [vmem:[#allocation5 + $0x990] sm:$0xff]  ;;  %1173 = vmatpush.msrb.mxu3 %v675_v40  ;;  %v292_v40 = vld [vmem:[#allocation5 + $0x3d8] sm:$0xff] }
 0x119   :  { %v539_v42 = vld [vmem:[#allocation5 + $0xb90] sm:$0xff]  ;;  %1115 = vmatpush.msrb.mxu0 %v475_v41  ;;  %1108 = vmatmul.f32.vlgmr.msra.gmra.mxu3 %v2222_v9  ;;  %v232_v9 = vld [vmem:[#allocation5 + $0x1f8] sm:$0xff] }
 0x11a   :  { %v603_v43 = vld [vmem:[#allocation5 + $0xd90] sm:$0xff]  ;;  %1135 = vmatpush.msrb.mxu1 %v539_v42  ;;  %v356_v41 = vld [vmem:[#allocation5 + $0x5d8] sm:$0xff] }
 0x11b   :  { %v671_v44 = vld [vmem:[#allocation5 + $0xfb0] sm:$0xff]  ;;  %1155 = vmatpush.msrb.mxu2 %v603_v43  ;;  %v424_v42 = vld [vmem:[#allocation5 + $0x7f8] sm:$0xff] }
 0x11c   :  { %v471_v45 = vld [vmem:[#allocation5 + $0x970] sm:$0xff]  ;;  %1174 = vmatpush.msrb.mxu3 %v671_v44  ;;  %v224_v43 = vld [vmem:[#allocation5 + $0x1b8] sm:$0xff] }
 0x11d   :  { %v535_v46 = vld [vmem:[#allocation5 + $0xb70] sm:$0xff]  ;;  %1116 = vmatpush.msrb.mxu0 %v471_v45  ;;  %v288_v44 = vld [vmem:[#allocation5 + $0x3b8] sm:$0xff] }
 0x11e   :  { %v599_v47 = vld [vmem:[#allocation5 + $0xd70] sm:$0xff]  ;;  %1136 = vmatpush.msrb.mxu1 %v535_v46  ;;  %v352_v45 = vld [vmem:[#allocation5 + $0x5b8] sm:$0xff] }
 0x11f   :  { %v667_v48 = vld [vmem:[#allocation5 + $0xf90] sm:$0xff]  ;;  %1156 = vmatpush.msrb.mxu2 %v599_v47  ;;  %v420_v46 = vld [vmem:[#allocation5 + $0x7d8] sm:$0xff] }
 0x120   :  { %v467_v49 = vld [vmem:[#allocation5 + $0x950] sm:$0xff]  ;;  %1175 = vmatpush.msrb.mxu3 %v667_v48  ;;  %v284_v47 = vld [vmem:[#allocation5 + $0x398] sm:$0xff] }
 0x121   :  { %v531_v50 = vld [vmem:[#allocation5 + $0xb50] sm:$0xff]  ;;  %1117 = vmatpush.msrb.mxu0 %v467_v49  ;;  %v348_v48 = vld [vmem:[#allocation5 + $0x598] sm:$0xff] }
 0x122   :  { %v595_v51 = vld [vmem:[#allocation5 + $0xd50] sm:$0xff]  ;;  %1137 = vmatpush.msrb.mxu1 %v531_v50  ;;  %v416_v49 = vld [vmem:[#allocation5 + $0x7b8] sm:$0xff] }
 0x123   :  { %v663_v52 = vld [vmem:[#allocation5 + $0xf70] sm:$0xff]  ;;  %1157 = vmatpush.msrb.mxu2 %v595_v51  ;;  %v344_v50 = vld [vmem:[#allocation5 + $0x578] sm:$0xff] }
 0x124   :  { %v463_v53 = vld [vmem:[#allocation5 + $0x930] sm:$0xff]  ;;  %1176 = vmatpush.msrb.mxu3 %v663_v52  ;;  %v412_v51 = vld [vmem:[#allocation5 + $0x798] sm:$0xff] }
 0x125   :  { %v527_v54 = vld [vmem:[#allocation5 + $0xb30] sm:$0xff]  ;;  %1118 = vmatpush.msrb.mxu0 %v463_v53  ;;  %v212_v52 = vld [vmem:[#allocation5 + $0x158] sm:$0xff] }
 0x126   :  { %v591_v55 = vld [vmem:[#allocation5 + $0xd30] sm:$0xff]  ;;  %1138 = vmatpush.msrb.mxu1 %v527_v54  ;;  %v276_v53 = vld [vmem:[#allocation5 + $0x358] sm:$0xff] }
 0x127   :  { %v659_v56 = vld [vmem:[#allocation5 + $0xf50] sm:$0xff]  ;;  %1158 = vmatpush.msrb.mxu2 %v591_v55  ;;  %v408_v54 = vld [vmem:[#allocation5 + $0x778] sm:$0xff] }
 0x128   :  { %v459_v57 = vld [vmem:[#allocation5 + $0x910] sm:$0xff]  ;;  %1177 = vmatpush.msrb.mxu3 %v659_v56  ;;  %v208_v55 = vld [vmem:[#allocation5 + $0x138] sm:$0xff] }
 0x129   :  { %v523_v58 = vld [vmem:[#allocation5 + $0xb10] sm:$0xff]  ;;  %1119 = vmatpush.msrb.mxu0 %v459_v57  ;;  %v272_v56 = vld [vmem:[#allocation5 + $0x338] sm:$0xff] }
 0x12a   :  { %v587_v59 = vld [vmem:[#allocation5 + $0xd10] sm:$0xff]  ;;  %1139 = vmatpush.msrb.mxu1 %v523_v58  ;;  %v336_v57 = vld [vmem:[#allocation5 + $0x538] sm:$0xff] }
 0x12b   :  { %v655_v60 = vld [vmem:[#allocation5 + $0xf30] sm:$0xff]  ;;  %1159 = vmatpush.msrb.mxu2 %v587_v59  ;;  %v404_v58 = vld [vmem:[#allocation5 + $0x758] sm:$0xff] }
 0x12c   :  { %v455_v61 = vld [vmem:[#allocation5 + $0x8f0] sm:$0xff]  ;;  %1178 = vmatpush.msrb.mxu3 %v655_v60  ;;  %v204_v59 = vld [vmem:[#allocation5 + $0x118] sm:$0xff] }
 0x12d   :  { %v519_v62 = vld [vmem:[#allocation5 + $0xaf0] sm:$0xff]  ;;  %1120 = vmatpush.msrb.mxu0 %v455_v61  ;;  %v268_v60 = vld [vmem:[#allocation5 + $0x318] sm:$0xff] }
 0x12e   :  { %v583_v63 = vld [vmem:[#allocation5 + $0xcf0] sm:$0xff]  ;;  %1140 = vmatpush.msrb.mxu1 %v519_v62  ;;  %v332_v61 = vld [vmem:[#allocation5 + $0x518] sm:$0xff] }
 0x12f   :  { %v651_v0 = vld [vmem:[#allocation5 + $0xf10] sm:$0xff]  ;;  %1160 = vmatpush.msrb.mxu2 %v583_v63  ;;  %v400_v62 = vld [vmem:[#allocation5 + $0x738] sm:$0xff] }
 0x130   :  { %v451_v4 = vld [vmem:[#allocation5 + $0x8d0] sm:$0xff]  ;;  %1179 = vmatpush.msrb.mxu3 %v651_v0  ;;  %v200_v63 = vld [vmem:[#allocation5 + $0xf8] sm:$0xff] }
 0x131   :  { %v515_v5 = vld [vmem:[#allocation5 + $0xad0] sm:$0xff]  ;;  %1121 = vmatpush.msrb.mxu0 %v451_v4  ;;  %v264_v0 = vld [vmem:[#allocation5 + $0x2f8] sm:$0xff] }
 0x132   :  { %v579_v6 = vld [vmem:[#allocation5 + $0xcd0] sm:$0xff]  ;;  %1141 = vmatpush.msrb.mxu1 %v515_v5  ;;  %v328_v4 = vld [vmem:[#allocation5 + $0x4f8] sm:$0xff] }
 0x133   :  { %v647_v7 = vld [vmem:[#allocation5 + $0xef0] sm:$0xff]  ;;  %1161 = vmatpush.msrb.mxu2 %v579_v6  ;;  %v396_v5 = vld [vmem:[#allocation5 + $0x718] sm:$0xff] }
 0x134   :  { %v447_v8 = vld [vmem:[#allocation5 + $0x8b0] sm:$0xff]  ;;  %1180 = vmatpush.msrb.mxu3 %v647_v7  ;;  %v196_v6 = vld [vmem:[#allocation5 + $0xd8] sm:$0xff] }
 0x135   :  { %v511_v10 = vld [vmem:[#allocation5 + $0xab0] sm:$0xff]  ;;  %1122 = vmatpush.msrb.mxu0 %v447_v8  ;;  %v260_v7 = vld [vmem:[#allocation5 + $0x2d8] sm:$0xff] }
 0x136   :  { %v575_v11 = vld [vmem:[#allocation5 + $0xcb0] sm:$0xff]  ;;  %1142 = vmatpush.msrb.mxu1 %v511_v10  ;;  %v324_v8 = vld [vmem:[#allocation5 + $0x4d8] sm:$0xff] }
 0x137   :  { %v643_v12 = vld [vmem:[#allocation5 + $0xed0] sm:$0xff]  ;;  %1162 = vmatpush.msrb.mxu2 %v575_v11  ;;  %v392_v10 = vld [vmem:[#allocation5 + $0x6f8] sm:$0xff] }
 0x138   :  { %v443_v13 = vld [vmem:[#allocation5 + $0x890] sm:$0xff]  ;;  %1181 = vmatpush.msrb.mxu3 %v643_v12  ;;  %v192_v11 = vld [vmem:[#allocation5 + $0xb8] sm:$0xff] }
 0x139   :  { %v507_v14 = vld [vmem:[#allocation5 + $0xa90] sm:$0xff]  ;;  %1123 = vmatpush.msrb.mxu0 %v443_v13  ;;  %v256_v12 = vld [vmem:[#allocation5 + $0x2b8] sm:$0xff] }
 0x13a   :  { %v571_v15 = vld [vmem:[#allocation5 + $0xc90] sm:$0xff]  ;;  %1143 = vmatpush.msrb.mxu1 %v507_v14  ;;  %v320_v13 = vld [vmem:[#allocation5 + $0x4b8] sm:$0xff] }
 0x13b   :  { %v639_v16 = vld [vmem:[#allocation5 + $0xeb0] sm:$0xff]  ;;  %1163 = vmatpush.msrb.mxu2 %v571_v15  ;;  %v388_v14 = vld [vmem:[#allocation5 + $0x6d8] sm:$0xff] }
 0x13c   :  { %v439_v17 = vld [vmem:[#allocation5 + $0x870] sm:$0xff]  ;;  %1182 = vmatpush.msrb.mxu3 %v639_v16  ;;  %v188_v15 = vld [vmem:[#allocation5 + $0x98] sm:$0xff] }
 0x13d   :  { %v503_v18 = vld [vmem:[#allocation5 + $0xa70] sm:$0xff]  ;;  %1124 = vmatpush.msrb.mxu0 %v439_v17  ;;  %v252_v16 = vld [vmem:[#allocation5 + $0x298] sm:$0xff] }
 0x13e   :  { %v567_v19 = vld [vmem:[#allocation5 + $0xc70] sm:$0xff]  ;;  %1144 = vmatpush.msrb.mxu1 %v503_v18  ;;  %v316_v17 = vld [vmem:[#allocation5 + $0x498] sm:$0xff] }
 0x13f   :  { %v635_v20 = vld [vmem:[#allocation5 + $0xe90] sm:$0xff]  ;;  %1164 = vmatpush.msrb.mxu2 %v567_v19  ;;  %v384_v18 = vld [vmem:[#allocation5 + $0x6b8] sm:$0xff] }
 0x140   :  { %v435_v22 = vld [vmem:[#allocation5 + $0x850] sm:$0xff]  ;;  %1183 = vmatpush.msrb.mxu3 %v635_v20  ;;  %v184_v19 = vld [vmem:[#allocation5 + $0x78] sm:$0xff] }
 0x141   :  { %v499_v23 = vld [vmem:[#allocation5 + $0xa50] sm:$0xff]  ;;  %1125 = vmatpush.msrb.mxu0 %v435_v22  ;;  %v248_v20 = vld [vmem:[#allocation5 + $0x278] sm:$0xff] }
 0x142   :  { %v563_v24 = vld [vmem:[#allocation5 + $0xc50] sm:$0xff]  ;;  %1145 = vmatpush.msrb.mxu1 %v499_v23  ;;  %v312_v22 = vld [vmem:[#allocation5 + $0x478] sm:$0xff] }
 0x143   :  { %v631_v28 = vld [vmem:[#allocation5 + $0xe70] sm:$0xff]  ;;  %1165 = vmatpush.msrb.mxu2 %v563_v24  ;;  %v380_v23 = vld [vmem:[#allocation5 + $0x698] sm:$0xff] }
 0x144   :  { %v431_v29 = vld [vmem:[#allocation5 + $0x830] sm:$0xff]  ;;  %1184 = vmatpush.msrb.mxu3 %v631_v28  ;;  %v180_v24 = vld [vmem:[#allocation5 + $0x58] sm:$0xff] }
 0x145   :  { %v495_v30 = vld [vmem:[#allocation5 + $0xa30] sm:$0xff]  ;;  %1126 = vmatpush.msrb.mxu0 %v431_v29  ;;  %v244_v28 = vld [vmem:[#allocation5 + $0x258] sm:$0xff] }
 0x146   :  { %v559_v3 = vld [vmem:[#allocation5 + $0xc30] sm:$0xff]  ;;  %1146 = vmatpush.msrb.mxu1 %v495_v30  ;;  %v308_v29 = vld [vmem:[#allocation5 + $0x458] sm:$0xff] }
 0x147   :  { %v627_v31 = vld [vmem:[#allocation5 + $0xe50] sm:$0xff]  ;;  %1166 = vmatpush.msrb.mxu2 %v559_v3  ;;  %v376_v30 = vld [vmem:[#allocation5 + $0x678] sm:$0xff] }
 0x148   :  { %v2250_v33 = vld.sshfl [vmem:[#allocation1 + $0x8] sm:$0xff pattern:$0x73625140]  ;;  %1185 = vmatpush.msrb.mxu3 %v627_v31  ;;  %v176_v3 = vld [vmem:[#allocation5 + $0x38] sm:$0xff] }
 0x149   :  { %1068 = vmatmul.f32.vlgmr.msra.gmra.mxu1 %v2250_v33  ;;  %v427_v34 = vld [vmem:[#allocation5 + $0x810] sm:$0xff]  ;;  %v240_v31 = vld [vmem:[#allocation5 + $0x238] sm:$0xff] }
 0x14a   :  { %v491_v1 = vld [vmem:[#allocation5 + $0xa10] sm:$0xff]  ;;  %1127 = vmatpush.msrb.mxu0 %v427_v34  ;;  %v304_v34 = vld [vmem:[#allocation5 + $0x438] sm:$0xff] }
 0x14b   :  { %v555_v35 = vld [vmem:[#allocation5 + $0xc10] sm:$0xff]  ;;  %1147 = vmatpush.msrb.mxu1 %v491_v1  ;;  %1128 = vmatmul.f32.vlgmr.msrb.gmra.mxu0 %v2227_v26  ;;  %v216_v26 = vld [vmem:[#allocation5 + $0x178] sm:$0xff] }
 0x14c   :  { %v623_v2 = vld [vmem:[#allocation5 + $0xe30] sm:$0xff]  ;;  %1167 = vmatpush.msrb.mxu2 %v555_v35  ;;  %1192 = vmatpush.msra.mxu0 %v232_v9  ;;  %v372_v1 = vld [vmem:[#allocation5 + $0x658] sm:$0xff] }
 0x14d   :  { %1186 = vmatpush.msrb.mxu3 %v623_v2  ;;  %v619_v38 = vld [vmem:[#allocation5 + $0xe10] sm:$0xff]  ;;  %1168 = vmatmul.f32.vlgmr.msrb.gmra.mxu2 %v2225_v21  ;;  %v220_v21 = vld [vmem:[#allocation5 + $0x198] sm:$0xff] }
 0x14e   :  { %1212 = vmatpush.msra.mxu1 %v296_v36  ;;  %1232 = vmatpush.msra.mxu2 %v360_v37  ;;  %v172_v35 = vld [vmem:[#allocation5 + $0x18] sm:$0xff] }
 0x14f   :  { %1187 = vmatpush.msrb.mxu3 %v619_v38  ;;  %1193 = vmatpush.msra.mxu0 %v228_v39  ;;  %v236_v2 = vld [vmem:[#allocation5 + $0x218] sm:$0xff] }
 0x150   :  { %1188 = vmatmul.f32.vlgmr.msrb.gmra.mxu3 %v2230_v27  ;;  %1213 = vmatpush.msra.mxu1 %v292_v40  ;;  %v280_v27 = vld [vmem:[#allocation5 + $0x378] sm:$0xff] }
 0x151   :  { %1233 = vmatpush.msra.mxu2 %v356_v41  ;;  %1252 = vmatpush.msra.mxu3 %v424_v42  ;;  %v300_v9 = vld [vmem:[#allocation5 + $0x418] sm:$0xff] }
 0x152   :  { %1148 = vmatmul.f32.vlgmr.msrb.gmra.mxu1 %v2233_v32  ;;  %1194 = vmatpush.msra.mxu0 %v224_v43  ;;  %v340_v32 = vld [vmem:[#allocation5 + $0x558] sm:$0xff] }
 0x153   :  { %1214 = vmatpush.msra.mxu1 %v288_v44  ;;  %1234 = vmatpush.msra.mxu2 %v352_v45  ;;  %v368_v36 = vld [vmem:[#allocation5 + $0x638] sm:$0xff] }
 0x154   :  { %1253 = vmatpush.msra.mxu3 %v420_v46  ;;  %1195 = vmatpush.msra.mxu0 %v220_v21  ;;  %v488_v37 = vld [vmem:[#allocation5 + $0x9f8] sm:$0xff] }
 0x155   :  { %1215 = vmatpush.msra.mxu1 %v284_v47  ;;  %1235 = vmatpush.msra.mxu2 %v348_v48  ;;  %v552_v38 = vld [vmem:[#allocation5 + $0xbf8] sm:$0xff] }
 0x156   :  { %1254 = vmatpush.msra.mxu3 %v416_v49  ;;  %1196 = vmatpush.msra.mxu0 %v216_v26  ;;  %v616_v39 = vld [vmem:[#allocation5 + $0xdf8] sm:$0xff] }
 0x157   :  { %1216 = vmatpush.msra.mxu1 %v280_v27  ;;  %1236 = vmatpush.msra.mxu2 %v344_v50  ;;  %v364_v40 = vld [vmem:[#allocation5 + $0x618] sm:$0xff] }
 0x158   :  { %1255 = vmatpush.msra.mxu3 %v412_v51  ;;  %1197 = vmatpush.msra.mxu0 %v212_v52  ;;  %v484_v41 = vld [vmem:[#allocation5 + $0x9d8] sm:$0xff] }
 0x159   :  { %1217 = vmatpush.msra.mxu1 %v276_v53  ;;  %1237 = vmatpush.msra.mxu2 %v340_v32  ;;  %v548_v42 = vld [vmem:[#allocation5 + $0xbd8] sm:$0xff] }
 0x15a   :  { %1256 = vmatpush.msra.mxu3 %v408_v54  ;;  %1198 = vmatpush.msra.mxu0 %v208_v55  ;;  %v612_v43 = vld [vmem:[#allocation5 + $0xdd8] sm:$0xff] }
 0x15b   :  { %1218 = vmatpush.msra.mxu1 %v272_v56  ;;  %1238 = vmatpush.msra.mxu2 %v336_v57  ;;  %v680_v44 = vld [vmem:[#allocation5 + $0xff8] sm:$0xff] }
 0x15c   :  { %1257 = vmatpush.msra.mxu3 %v404_v58  ;;  %1199 = vmatpush.msra.mxu0 %v204_v59  ;;  %v480_v45 = vld [vmem:[#allocation5 + $0x9b8] sm:$0xff] }
 0x15d   :  { %1219 = vmatpush.msra.mxu1 %v268_v60  ;;  %1239 = vmatpush.msra.mxu2 %v332_v61  ;;  %v544_v46 = vld [vmem:[#allocation5 + $0xbb8] sm:$0xff]  ;;  %v2257_v61 = vpop.f32.mrf.mxu0 }
 0x15e   :  { %1258 = vmatpush.msra.mxu3 %v400_v62  ;;  %1200 = vmatpush.msra.mxu0 %v200_v63  ;;  %v608_v21 = vld [vmem:[#allocation5 + $0xdb8] sm:$0xff] }
 0x15f   :  { %1220 = vmatpush.msra.mxu1 %v264_v0  ;;  %1240 = vmatpush.msra.mxu2 %v328_v4  ;;  %v676_v47 = vld [vmem:[#allocation5 + $0xfd8] sm:$0xff] }
 0x160   :  { %1259 = vmatpush.msra.mxu3 %v396_v5  ;;  %1201 = vmatpush.msra.mxu0 %v196_v6  ;;  %v476_v48 = vld [vmem:[#allocation5 + $0x998] sm:$0xff] }
 0x161   :  { %1221 = vmatpush.msra.mxu1 %v260_v7  ;;  %1241 = vmatpush.msra.mxu2 %v324_v8  ;;  %v540_v49 = vld [vmem:[#allocation5 + $0xb98] sm:$0xff] }
 0x162   :  { %1260 = vmatpush.msra.mxu3 %v392_v10  ;;  %1202 = vmatpush.msra.mxu0 %v192_v11  ;;  %v604_v26 = vld [vmem:[#allocation5 + $0xd98] sm:$0xff]  ;;  %v2259_v10 = vpop.f32.mrf.mxu1 }
 0x163   :  { %1222 = vmatpush.msra.mxu1 %v256_v12  ;;  %1242 = vmatpush.msra.mxu2 %v320_v13  ;;  %v672_v27 = vld [vmem:[#allocation5 + $0xfb8] sm:$0xff] }
 0x164   :  { %1261 = vmatpush.msra.mxu3 %v388_v14  ;;  %1203 = vmatpush.msra.mxu0 %v188_v15  ;;  %v472_v50 = vld [vmem:[#allocation5 + $0x978] sm:$0xff] }
 0x165   :  { %1223 = vmatpush.msra.mxu1 %v252_v16  ;;  %1243 = vmatpush.msra.mxu2 %v316_v17  ;;  %v536_v51 = vld [vmem:[#allocation5 + $0xb78] sm:$0xff] }
 0x166   :  { %1262 = vmatpush.msra.mxu3 %v384_v18  ;;  %1204 = vmatpush.msra.mxu0 %v184_v19  ;;  %v600_v52 = vld [vmem:[#allocation5 + $0xd78] sm:$0xff]  ;;  %v2261_v19 = vpop.f32.mrf.mxu2 }
 0x167   :  { %1224 = vmatpush.msra.mxu1 %v248_v20  ;;  %1244 = vmatpush.msra.mxu2 %v312_v22  ;;  %v668_v53 = vld [vmem:[#allocation5 + $0xf98] sm:$0xff] }
 0x168   :  { %1263 = vmatpush.msra.mxu3 %v380_v23  ;;  %1205 = vmatpush.msra.mxu0 %v180_v24  ;;  %v468_v32 = vld [vmem:[#allocation5 + $0x958] sm:$0xff] }
 0x169   :  { %1225 = vmatpush.msra.mxu1 %v244_v28  ;;  %1245 = vmatpush.msra.mxu2 %v308_v29  ;;  %v532_v54 = vld [vmem:[#allocation5 + $0xb58] sm:$0xff]  ;;  %v2263_v28 = vpop.f32.mrf.mxu0 }
 0x16a   :  { %1264 = vmatpush.msra.mxu3 %v376_v30  ;;  %1206 = vmatpush.msra.mxu0 %v176_v3  ;;  %v596_v55 = vld [vmem:[#allocation5 + $0xd58] sm:$0xff] }
 0x16b   :  { %1226 = vmatpush.msra.mxu1 %v240_v31  ;;  %1246 = vmatpush.msra.mxu2 %v304_v34  ;;  %v664_v56 = vld [vmem:[#allocation5 + $0xf78] sm:$0xff]  ;;  %v2265_v31 = vpop.f32.mrf.mxu3 }
 0x16c   :  { %1265 = vmatpush.msra.mxu3 %v372_v1  ;;  %1207 = vmatpush.msra.mxu0 %v172_v35  ;;  %v464_v57 = vld [vmem:[#allocation5 + $0x938] sm:$0xff] }
 0x16d   :  { %1227 = vmatpush.msra.mxu1 %v236_v2  ;;  %1247 = vmatpush.msra.mxu2 %v300_v9  ;;  %v528_v58 = vld [vmem:[#allocation5 + $0xb38] sm:$0xff]  ;;  %v2267_v2 = vld [vmem:[#allocation7] sm:$0xf]  ;;  %v2269_v9 = vpop.f32.mrf.mxu1 }
 0x16e   :  { %1266 = vmatpush.msra.mxu3 %v368_v36  ;;  %1272 = vmatpush.msrb.mxu0 %v488_v37  ;;  %v592_v59 = vld [vmem:[#allocation5 + $0xd38] sm:$0xff] }
 0x16f   :  { %1292 = vmatpush.msrb.mxu1 %v552_v38  ;;  %1312 = vmatpush.msrb.mxu2 %v616_v39  ;;  %v660_v60 = vld [vmem:[#allocation5 + $0xf58] sm:$0xff]  ;;  %v1853_v39 = vld.sshfl [vmem:[#allocation1 + $0x18] sm:$0xff pattern:$0x73625140] }
 0x170   :  { %1267 = vmatpush.msra.mxu3 %v364_v40  ;;  %1273 = vmatpush.msrb.mxu0 %v484_v41  ;;  %v460_v62 = vld [vmem:[#allocation5 + $0x918] sm:$0xff] }
 0x171   :  { %1293 = vmatpush.msrb.mxu1 %v548_v42  ;;  %1313 = vmatpush.msrb.mxu2 %v612_v43  ;;  %v524_v63 = vld [vmem:[#allocation5 + $0xb18] sm:$0xff]  ;;  %v683_v42 = vperm.slane %v2267_v2, 0 }
 0x172   :  { %1332 = vmatpush.msrb.mxu3 %v680_v44  ;;  %1274 = vmatpush.msrb.mxu0 %v480_v45  ;;  %v588_v0 = vld [vmem:[#allocation5 + $0xd18] sm:$0xff]  ;;  %v684_v45 = vperm.slane %v2267_v2, 1 }
 0x173   :  { %1294 = vmatpush.msrb.mxu1 %v544_v46  ;;  %1314 = vmatpush.msrb.mxu2 %v608_v21  ;;  %v656_v4 = vld [vmem:[#allocation5 + $0xf38] sm:$0xff]  ;;  %v2274_v46 = vpop.f32.mrf.mxu2 }
 0x174   :  { %1333 = vmatpush.msrb.mxu3 %v676_v47  ;;  %1275 = vmatpush.msrb.mxu0 %v476_v48  ;;  %v456_v5 = vld [vmem:[#allocation5 + $0x8f8] sm:$0xff]  ;;  %v889_v47 = vpop.f32.mrf.mxu0 }
 0x175   :  { %1295 = vmatpush.msrb.mxu1 %v540_v49  ;;  %1315 = vmatpush.msrb.mxu2 %v604_v26  ;;  %v520_v6 = vld [vmem:[#allocation5 + $0xaf8] sm:$0xff] }
 0x176   :  { %1334 = vmatpush.msrb.mxu3 %v672_v27  ;;  %1276 = vmatpush.msrb.mxu0 %v472_v50  ;;  %v584_v7 = vld [vmem:[#allocation5 + $0xcf8] sm:$0xff]  ;;  %v730_v27 = vadd.f32 %v2257_v61, %v683_v42 }
 0x177   :  { %1296 = vmatpush.msrb.mxu1 %v536_v51  ;;  %1316 = vmatpush.msrb.mxu2 %v600_v52  ;;  %v652_v8 = vld [vmem:[#allocation5 + $0xf18] sm:$0xff]  ;;  %v890_v52 = vadd.f32 %v889_v47, %v684_v45  ;;  %v1432_v45 = vld [vmem:[#allocation8 + $0x260] sm:$0xff] }
 0x178   :  { %1335 = vmatpush.msrb.mxu3 %v668_v53  ;;  %1277 = vmatpush.msrb.mxu0 %v468_v32  ;;  %v452_v11 = vld [vmem:[#allocation5 + $0x8d8] sm:$0xff]  ;;  %v2278_v53 = vpop.f32.mrf.mxu3 }
 0x179   :  { %1297 = vmatpush.msrb.mxu1 %v532_v54  ;;  %1317 = vmatpush.msrb.mxu2 %v596_v55  ;;  %v516_v12 = vld [vmem:[#allocation5 + $0xad8] sm:$0xff]  ;;  %v1384_v54 = vld [vmem:[#allocation8 + $0xe0] sm:$0xff] }
 0x17a   :  { %1336 = vmatpush.msrb.mxu3 %v664_v56  ;;  %1278 = vmatpush.msrb.mxu0 %v464_v57  ;;  %v580_v13 = vld [vmem:[#allocation5 + $0xcd8] sm:$0xff]  ;;  %v1416_v55 = vld [vmem:[#allocation8 + $0x1e0] sm:$0xff]  ;;  %v750_v57 = vadd.f32 %v2259_v10, %v730_v27 }
 0x17b   :  { %1298 = vmatpush.msrb.mxu1 %v528_v58  ;;  %1318 = vmatpush.msrb.mxu2 %v592_v59  ;;  %v648_v14 = vld [vmem:[#allocation5 + $0xef8] sm:$0xff]  ;;  %v1855_v58 = vld.sshfl [vmem:[#allocation1 + $0x20] sm:$0xff pattern:$0x73625140] }
 0x17c   :  { %1337 = vmatpush.msrb.mxu3 %v660_v60  ;;  %1279 = vmatpush.msrb.mxu0 %v460_v62  ;;  %v448_v15 = vld [vmem:[#allocation5 + $0x8b8] sm:$0xff]  ;;  %v1856_v59 = vld.sshfl [vmem:[#allocation1 + $0x38] sm:$0xff pattern:$0x73625140] }
 0x17d   :  { %1299 = vmatpush.msrb.mxu1 %v524_v63  ;;  %1319 = vmatpush.msrb.mxu2 %v588_v0  ;;  %v512_v16 = vld [vmem:[#allocation5 + $0xab8] sm:$0xff]  ;;  %v929_v63 = vpop.f32.mrf.mxu2  ;;  %v1448_v0 = vld [vmem:[#allocation8 + $0x2e0] sm:$0xff] }
 0x17e   :  { %1338 = vmatpush.msrb.mxu3 %v656_v4  ;;  %1280 = vmatpush.msrb.mxu0 %v456_v5  ;;  %v576_v17 = vld [vmem:[#allocation5 + $0xcb8] sm:$0xff]  ;;  %v1857_v4 = vld.sshfl [vmem:[#allocation1 + $0x28] sm:$0xff pattern:$0x73625140]  ;;  %v1380_v5 = vld [vmem:[#allocation8 + $0xc0] sm:$0xff] }
 0x17f   :  { %1300 = vmatpush.msrb.mxu1 %v520_v6  ;;  %1320 = vmatpush.msrb.mxu2 %v584_v7  ;;  %v644_v18 = vld [vmem:[#allocation5 + $0xed8] sm:$0xff]  ;;  %v1412_v6 = vld [vmem:[#allocation8 + $0x1c0] sm:$0xff] }
 0x180   :  { %1339 = vmatpush.msrb.mxu3 %v652_v8  ;;  %1281 = vmatpush.msrb.mxu0 %v452_v11  ;;  %v444_v20 = vld [vmem:[#allocation5 + $0x898] sm:$0xff]  ;;  %v770_v8 = vadd.f32 %v2261_v19, %v750_v57  ;;  %v969_v19 = vpop.f32.mrf.mxu0  ;;  %v1356_v57 = vld [vmem:[#allocation8] sm:$0xff] }
 0x181   :  { %1301 = vmatpush.msrb.mxu1 %v516_v12  ;;  %1321 = vmatpush.msrb.mxu2 %v580_v13  ;;  %v508_v22 = vld [vmem:[#allocation5 + $0xa98] sm:$0xff]  ;;  %v949_v13 = vpop.f32.mrf.mxu3 }
 0x182   :  { %1340 = vmatpush.msrb.mxu3 %v648_v14  ;;  %1282 = vmatpush.msrb.mxu0 %v448_v15  ;;  %v572_v23 = vld [vmem:[#allocation5 + $0xc98] sm:$0xff]  ;;  %v1444_v14 = vld [vmem:[#allocation8 + $0x2c0] sm:$0xff] }
 0x183   :  { %1302 = vmatpush.msrb.mxu1 %v512_v16  ;;  %v640_v24 = vld [vmem:[#allocation5 + $0xeb8] sm:$0xff]  ;;  %1322 = vmatpush.msrb.mxu2 %v576_v17  ;;  %v1376_v15 = vld [vmem:[#allocation8 + $0xa0] sm:$0xff] }
 0x184   :  { %1341 = vmatpush.msrb.mxu3 %v644_v18  ;;  %v440_v29 = vld [vmem:[#allocation5 + $0x878] sm:$0xff]  ;;  %1283 = vmatpush.msrb.mxu0 %v444_v20  ;;  %v1408_v16 = vld [vmem:[#allocation8 + $0x1a0] sm:$0xff]  ;;  %v790_v18 = vadd.f32 %v2265_v31, %v770_v8  ;;  %v1381_v8 = vld [vmem:[#allocation8 + $0xc8] sm:$0xff] }
 0x185   :  { %1303 = vmatpush.msrb.mxu1 %v508_v22  ;;  %v504_v30 = vld [vmem:[#allocation5 + $0xa78] sm:$0xff]  ;;  %1323 = vmatpush.msrb.mxu2 %v572_v23 }
 0x186   :  { %v568_v3 = vld [vmem:[#allocation5 + $0xc78] sm:$0xff]  ;;  %1342 = vmatpush.msrb.mxu3 %v640_v24  ;;  %1284 = vmatpush.msrb.mxu0 %v440_v29  ;;  %v1440_v24 = vld [vmem:[#allocation8 + $0x2a0] sm:$0xff] }
 0x187   :  { %v636_v34 = vld [vmem:[#allocation5 + $0xe98] sm:$0xff]  ;;  %1304 = vmatpush.msrb.mxu1 %v504_v30  ;;  %1324 = vmatpush.msrb.mxu2 %v568_v3  ;;  %v1372_v29 = vld [vmem:[#allocation8 + $0x80] sm:$0xff] }
 0x188   :  { %v1852_v1 = vld.sshfl [vmem:[#allocation1 + $0x10] sm:$0xff pattern:$0x73625140]  ;;  %1343 = vmatpush.msrb.mxu3 %v636_v34  ;;  %1208 = vmatmul.f32.vlgmr.msra.gmra.mxu0 %v2246_v25  ;;  %v1404_v30 = vld [vmem:[#allocation8 + $0x180] sm:$0xff]  ;;  %v810_v34 = vadd.f32 %v2263_v28, %v790_v18  ;;  %v1009_v28 = vpop.f32.mrf.mxu2  ;;  %v1445_v18 = vld [vmem:[#allocation8 + $0x2c8] sm:$0xff] }
 0x189   :  { %1248 = vmatmul.f32.vlgmr.msra.gmra.mxu2 %v1852_v1  ;;  %v436_v35 = vld [vmem:[#allocation5 + $0x858] sm:$0xff]  ;;  %1268 = vmatmul.f32.vlgmr.msra.gmra.mxu3 %v1853_v39  ;;  %v1400_v39 = vld [vmem:[#allocation8 + $0x160] sm:$0xff] }
 0x18a   :  { %v500_v36 = vld [vmem:[#allocation5 + $0xa58] sm:$0xff]  ;;  %1285 = vmatpush.msrb.mxu0 %v436_v35  ;;  %1228 = vmatmul.f32.vlgmr.msra.gmra.mxu1 %v2250_v33  ;;  %v909_v33 = vpop.f32.mrf.mxu1 }
 0x18b   :  { %v564_v37 = vld [vmem:[#allocation5 + $0xc58] sm:$0xff]  ;;  %1305 = vmatpush.msrb.mxu1 %v500_v36  ;;  %v910_v62 = vadd.f32 %v909_v33, %v890_v52  ;;  %v1392_v52 = vld [vmem:[#allocation8 + $0x120] sm:$0xff] }
 0x18c   :  { %v632_v38 = vld [vmem:[#allocation5 + $0xe78] sm:$0xff]  ;;  %1325 = vmatpush.msrb.mxu2 %v564_v37  ;;  %v1436_v37 = vld [vmem:[#allocation8 + $0x280] sm:$0xff] }
 0x18d   :  { %v432_v40 = vld [vmem:[#allocation5 + $0x838] sm:$0xff]  ;;  %1344 = vmatpush.msrb.mxu3 %v632_v38  ;;  %v930_v10 = vadd.f32 %v929_v63, %v910_v62  ;;  %v1368_v38 = vld [vmem:[#allocation8 + $0x60] sm:$0xff]  ;;  %v1385_v63 = vld [vmem:[#allocation8 + $0xe8] sm:$0xff] }
 0x18e   :  { %v496_v41 = vld [vmem:[#allocation5 + $0xa38] sm:$0xff]  ;;  %1286 = vmatpush.msrb.mxu0 %v432_v40 }
 0x18f   :  { %v560_v43 = vld [vmem:[#allocation5 + $0xc38] sm:$0xff]  ;;  %1306 = vmatpush.msrb.mxu1 %v496_v41  ;;  %v950_v20 = vadd.f32 %v949_v13, %v930_v10  ;;  %v830_v41 = vadd.f32 %v2269_v9, %v810_v34  ;;  %v1029_v9 = vpop.f32.mrf.mxu3  ;;  %v1413_v10 = vld [vmem:[#allocation8 + $0x1c8] sm:$0xff]  ;;  %v685_v34 = vperm.slane %v2267_v2, 2 }
 0x190   :  { %v628_v44 = vld [vmem:[#allocation5 + $0xe58] sm:$0xff]  ;;  %1326 = vmatpush.msrb.mxu2 %v560_v43 }
 0x191   :  { %v428_v25 = vld [vmem:[#allocation5 + $0x818] sm:$0xff]  ;;  %1345 = vmatpush.msrb.mxu3 %v628_v44  ;;  %v970_v1 = vadd.f32 %v969_v19, %v950_v20  ;;  %v1373_v19 = vld [vmem:[#allocation8 + $0x88] sm:$0xff] }
 0x192   :  { %v492_v21 = vld [vmem:[#allocation5 + $0xa18] sm:$0xff]  ;;  %1287 = vmatpush.msrb.mxu0 %v428_v25  ;;  %v989_v31 = vpop.f32.mrf.mxu1  ;;  %v1364_v25 = vld [vmem:[#allocation8 + $0x40] sm:$0xff] }
 0x193   :  { %v556_v48 = vld [vmem:[#allocation5 + $0xc18] sm:$0xff]  ;;  %1307 = vmatpush.msrb.mxu1 %v492_v21  ;;  %1288 = vmatmul.f32.vlgmr.msrb.gmra.mxu0 %v1855_v58  ;;  %v990_v42 = vadd.f32 %v989_v31, %v970_v1  ;;  %v1396_v21 = vld [vmem:[#allocation8 + $0x140] sm:$0xff]  ;;  %v1369_v31 = vld [vmem:[#allocation8 + $0x68] sm:$0xff] }
 0x194   :  { %v624_v49 = vld [vmem:[#allocation5 + $0xe38] sm:$0xff]  ;;  %1327 = vmatpush.msrb.mxu2 %v556_v48  ;;  %1308 = vmatmul.f32.vlgmr.msrb.gmra.mxu1 %v1857_v4  ;;  %v850_v48 = vadd.f32 %v2274_v46, %v830_v41  ;;  %v1388_v58 = vld [vmem:[#allocation8 + $0x100] sm:$0xff] }
 0x195   :  { %v1386_v26 = vld [vmem:[#allocation8 + $0xf0] sm:$0xff]  ;;  %1346 = vmatpush.msrb.mxu3 %v624_v49  ;;  %v1010_v49 = vadd.f32 %v1009_v28, %v990_v42  ;;  %v1420_v4 = vld [vmem:[#allocation8 + $0x200] sm:$0xff]  ;;  %v1411_v13 = vld [vmem:[#allocation8 + $0x1b8] sm:$0xff] }
 0x196   :  { %v1418_v50 = vld [vmem:[#allocation8 + $0x1f0] sm:$0xff]  ;;  %1490 = vmatpush.msra.mxu0 %v1386_v26  ;;  %v1375_v20 = vld [vmem:[#allocation8 + $0x98] sm:$0xff] }
 0x197   :  { %v620_v51 = vld [vmem:[#allocation5 + $0xe18] sm:$0xff]  ;;  %1510 = vmatpush.msra.mxu1 %v1418_v50  ;;  %v1428_v50 = vld [vmem:[#allocation8 + $0x240] sm:$0xff] }
 0x198   :  { %v1854_v32 = vld.sshfl [vmem:[#allocation1 + $0x30] sm:$0xff pattern:$0x73625140]  ;;  %1347 = vmatpush.msrb.mxu3 %v620_v51  ;;  %1491 = vmatpush.msra.mxu0 %v1384_v54  ;;  %v1360_v51 = vld [vmem:[#allocation8 + $0x20] sm:$0xff]  ;;  %v2289_v54 = vadd.f32 %v1029_v9, %v1010_v49  ;;  %v1433_v49 = vld [vmem:[#allocation8 + $0x268] sm:$0xff] }
 0x199   :  { %1328 = vmatmul.f32.vlgmr.msrb.gmra.mxu2 %v1854_v32  ;;  %v1450_v56 = vld [vmem:[#allocation8 + $0x2f0] sm:$0xff]  ;;  %1348 = vmatmul.f32.vlgmr.msrb.gmra.mxu3 %v1856_v59  ;;  %v2287_v32 = vadd.f32 %v2278_v53, %v850_v48  ;;  %v1419_v53 = vld [vmem:[#allocation8 + $0x1f8] sm:$0xff]  ;;  %v1089_v48 = vpop.f32.mrf.mxu2 }
 0x19a   :  { %v1382_v60 = vld [vmem:[#allocation8 + $0xd0] sm:$0xff]  ;;  %1511 = vmatpush.msra.mxu1 %v1416_v55  ;;  %1530 = vmatpush.msra.mxu2 %v1450_v56  ;;  %v1424_v56 = vld [vmem:[#allocation8 + $0x220] sm:$0xff]  ;;  %v1439_v1 = vld [vmem:[#allocation8 + $0x298] sm:$0xff] }
 0x19b   :  { %v1414_v61 = vld [vmem:[#allocation8 + $0x1d0] sm:$0xff]  ;;  %1492 = vmatpush.msra.mxu0 %v1382_v60  ;;  %v1352_v59 = vmax.f32 %v2287_v32, 0.0  ;;  %v1353_v60 = vmax.f32 %v2289_v54, 0.0  ;;  %v1367_v41 = vld [vmem:[#allocation8 + $0x58] sm:$0xff]  ;;  %v1456_v32 = vld [vmem:[#allocation8 + $0x320] sm:$0xff] }
 0x19c   :  { %1512 = vmatpush.msra.mxu1 %v1414_v61  ;;  %v1446_v7 = vld [vmem:[#allocation8 + $0x2d0] sm:$0xff]  ;;  %1531 = vmatpush.msra.mxu2 %v1448_v0  ;;  %v1387_v61 = vld [vmem:[#allocation8 + $0xf8] sm:$0xff]  ;;  %v1417_v0 = vld [vmem:[#allocation8 + $0x1e8] sm:$0xff] }
 0x19d   :  { %v1378_v11 = vld [vmem:[#allocation8 + $0xb0] sm:$0xff]  ;;  %1493 = vmatpush.msra.mxu0 %v1380_v5  ;;  %v1383_v5 = vld [vmem:[#allocation8 + $0xd8] sm:$0xff] }
 0x19e   :  { %v1410_v12 = vld [vmem:[#allocation8 + $0x1b0] sm:$0xff]  ;;  %1513 = vmatpush.msra.mxu1 %v1412_v6  ;;  %1532 = vmatpush.msra.mxu2 %v1446_v7  ;;  %v1415_v6 = vld [vmem:[#allocation8 + $0x1d8] sm:$0xff] }
 0x19f   :  { %1494 = vmatpush.msra.mxu0 %v1378_v11  ;;  %v1442_v17 = vld [vmem:[#allocation8 + $0x2b0] sm:$0xff]  ;;  %v1451_v7 = vld [vmem:[#allocation8 + $0x2f8] sm:$0xff]  ;;  %v1449_v11 = vld [vmem:[#allocation8 + $0x2e8] sm:$0xff] }
 0x1a0   :  { %1514 = vmatpush.msra.mxu1 %v1410_v12  ;;  %v1374_v22 = vld [vmem:[#allocation8 + $0x90] sm:$0xff]  ;;  %1533 = vmatpush.msra.mxu2 %v1444_v14  ;;  %v1379_v12 = vld [vmem:[#allocation8 + $0xb8] sm:$0xff] }
 0x1a1   :  { %v1406_v23 = vld [vmem:[#allocation8 + $0x190] sm:$0xff]  ;;  %1495 = vmatpush.msra.mxu0 %v1376_v15  ;;  %v1447_v14 = vld [vmem:[#allocation8 + $0x2d8] sm:$0xff]  ;;  %v1377_v15 = vld [vmem:[#allocation8 + $0xa8] sm:$0xff] }
 0x1a2   :  { %1515 = vmatpush.msra.mxu1 %v1408_v16  ;;  %1534 = vmatpush.msra.mxu2 %v1442_v17  ;;  %v1438_v3 = vld [vmem:[#allocation8 + $0x290] sm:$0xff]  ;;  %v1409_v16 = vld [vmem:[#allocation8 + $0x1a8] sm:$0xff]  ;;  %v1399_v42 = vld [vmem:[#allocation8 + $0x158] sm:$0xff] }
 0x1a3   :  { %1496 = vmatpush.msra.mxu0 %v1374_v22  ;;  %v1370_v35 = vld [vmem:[#allocation8 + $0x70] sm:$0xff]  ;;  %v1407_v22 = vld [vmem:[#allocation8 + $0x198] sm:$0xff] }
 0x1a4   :  { %1516 = vmatpush.msra.mxu1 %v1406_v23  ;;  %v1402_v36 = vld [vmem:[#allocation8 + $0x170] sm:$0xff]  ;;  %1535 = vmatpush.msra.mxu2 %v1440_v24  ;;  %v1443_v23 = vld [vmem:[#allocation8 + $0x2b8] sm:$0xff]  ;;  %v1405_v24 = vld [vmem:[#allocation8 + $0x188] sm:$0xff] }
 0x1a5   :  { %1497 = vmatpush.msra.mxu0 %v1372_v29  ;;  %v1434_v40 = vld [vmem:[#allocation8 + $0x270] sm:$0xff]  ;;  %v1441_v29 = vld [vmem:[#allocation8 + $0x2a8] sm:$0xff]  ;;  %v1395_v9 = vld [vmem:[#allocation8 + $0x138] sm:$0xff] }
 0x1a6   :  { %1517 = vmatpush.msra.mxu1 %v1404_v30  ;;  %1536 = vmatpush.msra.mxu2 %v1438_v3  ;;  %v1366_v43 = vld [vmem:[#allocation8 + $0x50] sm:$0xff]  ;;  %v1371_v30 = vld [vmem:[#allocation8 + $0x78] sm:$0xff] }
 0x1a7   :  { %1498 = vmatpush.msra.mxu0 %v1370_v35  ;;  %v1398_v44 = vld [vmem:[#allocation8 + $0x150] sm:$0xff]  ;;  %v1403_v3 = vld [vmem:[#allocation8 + $0x178] sm:$0xff]  ;;  %v1480_v35 = vld [vmem:[#allocation8 + $0x3e0] sm:$0xff] }
 0x1a8   :  { %1518 = vmatpush.msra.mxu1 %v1402_v36  ;;  %1537 = vmatpush.msra.mxu2 %v1436_v37  ;;  %v1430_v47 = vld [vmem:[#allocation8 + $0x250] sm:$0xff]  ;;  %v1401_v37 = vld [vmem:[#allocation8 + $0x168] sm:$0xff] }
 0x1a9   :  { %1499 = vmatpush.msra.mxu0 %v1368_v38  ;;  %v1362_v26 = vld [vmem:[#allocation8 + $0x30] sm:$0xff]  ;;  %v1049_v38 = vpop.f32.mrf.mxu0 }
 0x1aa   :  { %1519 = vmatpush.msra.mxu1 %v1400_v39  ;;  %1538 = vmatpush.msra.mxu2 %v1434_v40  ;;  %v1394_v27 = vld [vmem:[#allocation8 + $0x130] sm:$0xff]  ;;  %v1437_v39 = vld [vmem:[#allocation8 + $0x288] sm:$0xff]  ;;  %v1476_v40 = vld [vmem:[#allocation8 + $0x3c0] sm:$0xff] }
 0x1ab   :  { %1500 = vmatpush.msra.mxu0 %v1366_v43  ;;  %v1426_v33 = vld [vmem:[#allocation8 + $0x230] sm:$0xff]  ;;  %v1050_v43 = vadd.f32 %v1049_v38, %v685_v34  ;;  %v1471_v34 = vld [vmem:[#allocation8 + $0x398] sm:$0xff] }
 0x1ac   :  { %1520 = vmatpush.msra.mxu1 %v1398_v44  ;;  %1539 = vmatpush.msra.mxu2 %v1432_v45  ;;  %v1358_v46 = vld [vmem:[#allocation8 + $0x10] sm:$0xff]  ;;  %v1435_v44 = vld [vmem:[#allocation8 + $0x278] sm:$0xff]  ;;  %v1365_v45 = vld [vmem:[#allocation8 + $0x48] sm:$0xff] }
 0x1ad   :  { %1501 = vmatpush.msra.mxu0 %v1364_v25  ;;  %v1390_v55 = vld [vmem:[#allocation8 + $0x110] sm:$0xff]  ;;  %v1397_v25 = vld [vmem:[#allocation8 + $0x148] sm:$0xff]  ;;  %v1459_v38 = vld [vmem:[#allocation8 + $0x338] sm:$0xff] }
 0x1ae   :  { %1521 = vmatpush.msra.mxu1 %v1396_v21  ;;  %1540 = vmatpush.msra.mxu2 %v1430_v47  ;;  %v1422_v62 = vld [vmem:[#allocation8 + $0x210] sm:$0xff] }
 0x1af   :  { %1502 = vmatpush.msra.mxu0 %v1362_v26  ;;  %v1482_v17 = vld [vmem:[#allocation8 + $0x3f0] sm:$0xff]  ;;  %v1472_v26 = vld [vmem:[#allocation8 + $0x3a0] sm:$0xff] }
 0x1b0   :  { %1522 = vmatpush.msra.mxu1 %v1394_v27  ;;  %1541 = vmatpush.msra.mxu2 %v1428_v50  ;;  %v1478_v36 = vld [vmem:[#allocation8 + $0x3d0] sm:$0xff]  ;;  %v1363_v27 = vld [vmem:[#allocation8 + $0x38] sm:$0xff] }
 0x1b1   :  { %1503 = vmatpush.msra.mxu0 %v1360_v51  ;;  %1550 = vmatpush.msra.mxu3 %v1482_v17  ;;  %v1474_v28 = vld [vmem:[#allocation8 + $0x3b0] sm:$0xff]  ;;  %v1431_v51 = vld [vmem:[#allocation8 + $0x258] sm:$0xff]  ;;  %v1421_v17 = vld [vmem:[#allocation8 + $0x208] sm:$0xff] }
 0x1b2   :  { %1523 = vmatpush.msra.mxu1 %v1392_v52  ;;  %1542 = vmatpush.msra.mxu2 %v1426_v33  ;;  %v1470_v52 = vld [vmem:[#allocation8 + $0x390] sm:$0xff]  ;;  %v1361_v33 = vld [vmem:[#allocation8 + $0x28] sm:$0xff] }
 0x1b3   :  { %1504 = vmatpush.msra.mxu0 %v1358_v46  ;;  %1551 = vmatpush.msra.mxu3 %v1480_v35  ;;  %v1393_v46 = vld [vmem:[#allocation8 + $0x128] sm:$0xff]  ;;  %v1454_v54 = vld [vmem:[#allocation8 + $0x310] sm:$0xff]  ;;  %v1467_v35 = vld [vmem:[#allocation8 + $0x378] sm:$0xff] }
 0x1b4   :  { %1524 = vmatpush.msra.mxu1 %v1390_v55  ;;  %1543 = vmatpush.msra.mxu2 %v1424_v56  ;;  %v1109_v55 = vpop.f32.mrf.mxu3 }
 0x1b5   :  { %1505 = vmatpush.msra.mxu0 %v1356_v57  ;;  %1552 = vmatpush.msra.mxu3 %v1478_v36  ;;  %v1429_v57 = vld [vmem:[#allocation8 + $0x248] sm:$0xff] }
 0x1b6   :  { %1525 = vmatpush.msra.mxu1 %v1388_v58  ;;  %1506 = vmatmul.f32.vlgmr.msra.gmra.mxu0 %v1352_v59  ;;  %v1468_v58 = vld [vmem:[#allocation8 + $0x380] sm:$0xff]  ;;  %v1465_v36 = vld [vmem:[#allocation8 + $0x368] sm:$0xff] }
 0x1b7   :  { %1526 = vmatmul.f32.vlgmr.msra.gmra.mxu1 %v1353_v60  ;;  %1570 = vmatpush.msrb.mxu0 %v1387_v61  ;;  %v1359_v61 = vld [vmem:[#allocation8 + $0x18] sm:$0xff] }
 0x1b8   :  { %1590 = vmatpush.msrb.mxu1 %v1419_v53  ;;  %1544 = vmatpush.msra.mxu2 %v1422_v62  ;;  %v1391_v53 = vld [vmem:[#allocation8 + $0x118] sm:$0xff] }
 0x1b9   :  { %1571 = vmatpush.msrb.mxu0 %v1385_v63  ;;  %1553 = vmatpush.msra.mxu3 %v1476_v40  ;;  %v1427_v63 = vld [vmem:[#allocation8 + $0x238] sm:$0xff] }
 0x1ba   :  { %1591 = vmatpush.msrb.mxu1 %v1417_v0  ;;  %1545 = vmatpush.msra.mxu2 %v1420_v4  ;;  %v1466_v0 = vld [vmem:[#allocation8 + $0x370] sm:$0xff]  ;;  %v1357_v4 = vld [vmem:[#allocation8 + $0x8] sm:$0xff]  ;;  %v1455_v40 = vld [vmem:[#allocation8 + $0x318] sm:$0xff] }
 0x1bb   :  { %1572 = vmatpush.msrb.mxu0 %v1383_v5  ;;  %1554 = vmatpush.msra.mxu3 %v1474_v28  ;;  %v1389_v5 = vld [vmem:[#allocation8 + $0x108] sm:$0xff] }
 0x1bc   :  { %1592 = vmatpush.msrb.mxu1 %v1415_v6  ;;  %1610 = vmatpush.msrb.mxu2 %v1451_v7 }
 0x1bd   :  { %1573 = vmatpush.msrb.mxu0 %v1381_v8  ;;  %1555 = vmatpush.msra.mxu3 %v1472_v26  ;;  %v1425_v8 = vld [vmem:[#allocation8 + $0x228] sm:$0xff] }
 0x1be   :  { %1593 = vmatpush.msrb.mxu1 %v1413_v10  ;;  %1611 = vmatpush.msrb.mxu2 %v1449_v11  ;;  %v1464_v10 = vld [vmem:[#allocation8 + $0x360] sm:$0xff] }
 0x1bf   :  { %1574 = vmatpush.msrb.mxu0 %v1379_v12  ;;  %1556 = vmatpush.msra.mxu3 %v1470_v52 }
 0x1c0   :  { %1594 = vmatpush.msrb.mxu1 %v1411_v13  ;;  %1612 = vmatpush.msrb.mxu2 %v1447_v14  ;;  %v1423_v13 = vld [vmem:[#allocation8 + $0x218] sm:$0xff]  ;;  %v1462_v14 = vld [vmem:[#allocation8 + $0x350] sm:$0xff] }
 0x1c1   :  { %1575 = vmatpush.msrb.mxu0 %v1377_v15  ;;  %1557 = vmatpush.msra.mxu3 %v1468_v58  ;;  %v1682_v58 = vld [vmem:[#allocation11 + $0xf0] sm:$0xff] }
 0x1c2   :  { %1595 = vmatpush.msrb.mxu1 %v1409_v16  ;;  %1613 = vmatpush.msrb.mxu2 %v1445_v18  ;;  %v1460_v18 = vld [vmem:[#allocation8 + $0x340] sm:$0xff] }
 0x1c3   :  { %1576 = vmatpush.msrb.mxu0 %v1375_v20  ;;  %1558 = vmatpush.msra.mxu3 %v1466_v0  ;;  %v1679_v0 = vld [vmem:[#allocation11 + $0xd8] sm:$0xff] }
 0x1c4   :  { %1596 = vmatpush.msrb.mxu1 %v1407_v22  ;;  %1614 = vmatpush.msrb.mxu2 %v1443_v23  ;;  %v1458_v22 = vld [vmem:[#allocation8 + $0x330] sm:$0xff] }
 0x1c5   :  { %1577 = vmatpush.msrb.mxu0 %v1373_v19  ;;  %1559 = vmatpush.msra.mxu3 %v1464_v10  ;;  %v1481_v19 = vld [vmem:[#allocation8 + $0x3e8] sm:$0xff] }
 0x1c6   :  { %1597 = vmatpush.msrb.mxu1 %v1405_v24  ;;  %1615 = vmatpush.msrb.mxu2 %v1441_v29  ;;  %v1069_v21 = vpop.f32.mrf.mxu1  ;;  %v1479_v24 = vld [vmem:[#allocation8 + $0x3d8] sm:$0xff]  ;;  %v1477_v29 = vld [vmem:[#allocation8 + $0x3c8] sm:$0xff] }
 0x1c7   :  { %1578 = vmatpush.msrb.mxu0 %v1371_v30  ;;  %v1070_v47 = vadd.f32 %v1069_v21, %v1050_v43  ;;  %1560 = vmatpush.msra.mxu3 %v1462_v14  ;;  %v1475_v30 = vld [vmem:[#allocation8 + $0x3b8] sm:$0xff]  ;;  %v1676_v10 = vld [vmem:[#allocation11 + $0xc0] sm:$0xff]  ;;  %v1657_v14 = vld [vmem:[#allocation11 + $0x28] sm:$0xff] }
 0x1c8   :  { %1598 = vmatpush.msrb.mxu1 %v1403_v3  ;;  %1616 = vmatpush.msrb.mxu2 %v1439_v1  ;;  %v1129_v62 = vpop.f32.mrf.mxu0  ;;  %v1473_v3 = vld [vmem:[#allocation8 + $0x3a8] sm:$0xff] }
 0x1c9   :  { %1579 = vmatpush.msrb.mxu0 %v1369_v31  ;;  %v1090_v50 = vadd.f32 %v1089_v48, %v1070_v47  ;;  %1561 = vmatpush.msra.mxu3 %v1460_v18  ;;  %v1469_v1 = vld [vmem:[#allocation8 + $0x388] sm:$0xff]  ;;  %v1463_v31 = vld [vmem:[#allocation8 + $0x358] sm:$0xff] }
 0x1ca   :  { %1599 = vmatpush.msrb.mxu1 %v1401_v37  ;;  %1617 = vmatpush.msrb.mxu2 %v1437_v39  ;;  %v1461_v37 = vld [vmem:[#allocation8 + $0x348] sm:$0xff]  ;;  %v1674_v18 = vld [vmem:[#allocation11 + $0xb0] sm:$0xff] }
 0x1cb   :  { %1580 = vmatpush.msrb.mxu0 %v1367_v41  ;;  %v1110_v56 = vadd.f32 %v1109_v55, %v1090_v50  ;;  %1562 = vmatpush.msra.mxu3 %v1458_v22  ;;  %v1457_v39 = vld [vmem:[#allocation8 + $0x328] sm:$0xff]  ;;  %v1666_v55 = vld [vmem:[#allocation11 + $0x70] sm:$0xff] }
 0x1cc   :  { %1600 = vmatpush.msrb.mxu1 %v1399_v42  ;;  %1618 = vmatpush.msrb.mxu2 %v1435_v44  ;;  %v1453_v41 = vld [vmem:[#allocation8 + $0x308] sm:$0xff]  ;;  %v686_v42 = vperm.slane %v2267_v2, 3  ;;  %v1667_v2 = vld [vmem:[#allocation11 + $0x78] sm:$0xff] }
 0x1cd   :  { %1581 = vmatpush.msrb.mxu0 %v1365_v45  ;;  %v1130_v6 = vadd.f32 %v1129_v62, %v1110_v56  ;;  %1563 = vmatpush.msra.mxu3 %v1456_v32  ;;  %v1683_v56 = vld [vmem:[#allocation11 + $0xf8] sm:$0xff]  ;;  %v1680_v62 = vld [vmem:[#allocation11 + $0xe0] sm:$0xff]  ;;  %v1673_v22 = vld [vmem:[#allocation11 + $0xa8] sm:$0xff] }
 0x1ce   :  { %1601 = vmatpush.msrb.mxu1 %v1397_v25  ;;  %1619 = vmatpush.msrb.mxu2 %v1433_v49  ;;  %v1672_v32 = vld [vmem:[#allocation11 + $0xa0] sm:$0xff] }
 0x1cf   :  { %1582 = vmatpush.msrb.mxu0 %v1363_v27  ;;  %v1149_v7 = vpop.f32.mrf.mxu1  ;;  %1564 = vmatpush.msra.mxu3 %v1454_v54  ;;  %v1671_v54 = vld [vmem:[#allocation11 + $0x98] sm:$0xff] }
 0x1d0   :  { %1602 = vmatpush.msrb.mxu1 %v1395_v9  ;;  %1620 = vmatpush.msrb.mxu2 %v1431_v51  ;;  %v1150_v11 = vadd.f32 %v1149_v7, %v1130_v6  ;;  %v1169_v12 = vpop.f32.mrf.mxu2  ;;  %v1661_v6 = vld [vmem:[#allocation11 + $0x48] sm:$0xff] }
 0x1d1   :  { %1583 = vmatpush.msrb.mxu0 %v1361_v33  ;;  %v1677_v7 = vld [vmem:[#allocation11 + $0xc8] sm:$0xff] }
 0x1d2   :  { %1603 = vmatpush.msrb.mxu1 %v1393_v46  ;;  %1621 = vmatpush.msrb.mxu2 %v1429_v57  ;;  %v1170_v15 = vadd.f32 %v1169_v12, %v1150_v11  ;;  %v1665_v57 = vld [vmem:[#allocation11 + $0x68] sm:$0xff]  ;;  %v1659_v11 = vld [vmem:[#allocation11 + $0x38] sm:$0xff] }
 0x1d3   :  { %1584 = vmatpush.msrb.mxu0 %v1359_v61  ;;  %v1189_v16 = vpop.f32.mrf.mxu3  ;;  %v1681_v61 = vld [vmem:[#allocation11 + $0xe8] sm:$0xff]  ;;  %v1675_v12 = vld [vmem:[#allocation11 + $0xb8] sm:$0xff] }
 0x1d4   :  { %1604 = vmatpush.msrb.mxu1 %v1391_v53  ;;  %1622 = vmatpush.msrb.mxu2 %v1427_v63  ;;  %v1190_v20 = vadd.f32 %v1189_v16, %v1170_v15  ;;  %v1664_v53 = vld [vmem:[#allocation11 + $0x60] sm:$0xff]  ;;  %v1663_v63 = vld [vmem:[#allocation11 + $0x58] sm:$0xff] }
 0x1d5   :  { %1585 = vmatpush.msrb.mxu0 %v1357_v4  ;;  %v1662_v4 = vld [vmem:[#allocation11 + $0x50] sm:$0xff]  ;;  %v1656_v15 = vld [vmem:[#allocation11 + $0x20] sm:$0xff]  ;;  %v1655_v16 = vld [vmem:[#allocation11 + $0x18] sm:$0xff] }
 0x1d6   :  { %1605 = vmatpush.msrb.mxu1 %v1389_v5  ;;  %1586 = vmatmul.f32.vlgmr.msrb.gmra.mxu0 %v1352_v59  ;;  %v1354_v23 = vmax.f32 %v1190_v20, 0.0  ;;  %v1452_v59 = vld [vmem:[#allocation8 + $0x300] sm:$0xff]  ;;  %v1678_v5 = vld [vmem:[#allocation11 + $0xd0] sm:$0xff]  ;;  %v1653_v20 = vld [vmem:[#allocation11 + $0x8] sm:$0xff] }
 0x1d7   :  { %1606 = vmatmul.f32.vlgmr.msrb.gmra.mxu1 %v1353_v60  ;;  %1623 = vmatpush.msrb.mxu2 %v1425_v8  ;;  %v1483_v60 = vld [vmem:[#allocation8 + $0x3f8] sm:$0xff]  ;;  %v1660_v8 = vld [vmem:[#allocation11 + $0x40] sm:$0xff] }
 0x1d8   :  { %1546 = vmatmul.f32.vlgmr.msra.gmra.mxu2 %v1354_v23  ;;  %1565 = vmatpush.msra.mxu3 %v1452_v59  ;;  %v1670_v59 = vld [vmem:[#allocation11 + $0x90] sm:$0xff] }
 0x1d9   :  { %1624 = vmatpush.msrb.mxu2 %v1423_v13  ;;  %1688 = vmatpush.msra.mxu0 %v1667_v2  ;;  %v1658_v13 = vld [vmem:[#allocation11 + $0x30] sm:$0xff]  ;;  %v1733_v2 = vld [vmem:[%s2385_s7 + $0x20] sm:$0xff] }
 0x1da   :  { %1630 = vmatpush.msrb.mxu3 %v1483_v60  ;;  %1708 = vmatpush.msra.mxu1 %v1683_v56  ;;  %v1669_v60 = vld [vmem:[#allocation11 + $0x88] sm:$0xff]  ;;  %v1731_v56 = vld [vmem:[%s2385_s7 + $0x10] sm:$0xff] }
 0x1db   :  { %1625 = vmatpush.msrb.mxu2 %v1421_v17  ;;  %1689 = vmatpush.msra.mxu0 %v1666_v55  ;;  %v1654_v17 = vld [vmem:[#allocation11 + $0x10] sm:$0xff]  ;;  %v1732_v55 = vld [vmem:[%s2385_s7 + $0x18] sm:$0xff] }
 0x1dc   :  { %1631 = vmatpush.msrb.mxu3 %v1481_v19  ;;  %1709 = vmatpush.msra.mxu1 %v1682_v58  ;;  %v1668_v19 = vld [vmem:[#allocation11 + $0x80] sm:$0xff] }
 0x1dd   :  { %1690 = vmatpush.msra.mxu0 %v1665_v57  ;;  %v1730_v57 = vld [vmem:[%s2385_s7 + $0x8] sm:$0xff]  ;;  %v1729_v58 = vld [vmem:[%s2385_s7] sm:$0xff] }
 0x1de   :  { %1632 = vmatpush.msrb.mxu3 %v1479_v24  ;;  %1710 = vmatpush.msra.mxu1 %v1681_v61  ;;  %v1744_v24 = vld [vmem:[%s2385_s7 + $0x78] sm:$0xff] }
 0x1df   :  { %1691 = vmatpush.msra.mxu0 %v1664_v53  ;;  %1749 = vmatpush.msra.mxu2 %v1744_v24  ;;  %v1777_v61 = vld [vmem:[%s2387_s9 + $0x38] sm:$0xff]  ;;  %v1776_v53 = vld [vmem:[%s2387_s9 + $0x30] sm:$0xff] }
 0x1e0   :  { %1626 = vmatmul.f32.vlgmr.msrb.gmra.mxu2 %v1354_v23  ;;  %1633 = vmatpush.msrb.mxu3 %v1477_v29  ;;  %v1652_v23 = vld [vmem:[#allocation11] sm:$0xff]  ;;  %v1743_v29 = vld [vmem:[%s2385_s7 + $0x70] sm:$0xff] }
 0x1e1   :  { %1711 = vmatpush.msra.mxu1 %v1680_v62  ;;  %1692 = vmatpush.msra.mxu0 %v1663_v63  ;;  %v1775_v62 = vld [vmem:[%s2387_s9 + $0x28] sm:$0xff]  ;;  %v1774_v63 = vld [vmem:[%s2387_s9 + $0x20] sm:$0xff] }
 0x1e2   :  { %1634 = vmatpush.msrb.mxu3 %v1475_v30  ;;  %v1742_v30 = vld [vmem:[%s2385_s7 + $0x68] sm:$0xff]  ;;  %1750 = vmatpush.msra.mxu2 %v1743_v29 }
 0x1e3   :  { %1712 = vmatpush.msra.mxu1 %v1679_v0  ;;  %1693 = vmatpush.msra.mxu0 %v1662_v4  ;;  %v1773_v0 = vld [vmem:[%s2387_s9 + $0x18] sm:$0xff] }
 0x1e4   :  { %1635 = vmatpush.msrb.mxu3 %v1473_v3  ;;  %v1741_v3 = vld [vmem:[%s2385_s7 + $0x60] sm:$0xff]  ;;  %1751 = vmatpush.msra.mxu2 %v1742_v30  ;;  %v1847_v4 = vld [vmem:[#allocation13] ss:$0 sm:$0xff] }
 0x1e5   :  { %1713 = vmatpush.msra.mxu1 %v1678_v5  ;;  %1694 = vmatpush.msra.mxu0 %v1661_v6 }
 0x1e6   :  { %1636 = vmatpush.msrb.mxu3 %v1471_v34  ;;  %v1484_v34 = vld [vmem:[#allocation10] sm:$0x3]  ;;  %1752 = vmatpush.msra.mxu2 %v1741_v3 }
 0x1e7   :  { %1714 = vmatpush.msra.mxu1 %v1677_v7  ;;  %1695 = vmatpush.msra.mxu0 %v1660_v8 }
 0x1e8   :  { %1637 = vmatpush.msrb.mxu3 %v1469_v1  ;;  %v1740_v1 = vld [vmem:[%s2385_s7 + $0x58] sm:$0xff] }
 0x1e9   :  { %1715 = vmatpush.msra.mxu1 %v1676_v10  ;;  %1696 = vmatpush.msra.mxu0 %v1659_v11  ;;  %v1772_v11 = vld [vmem:[%s2387_s9 + $0x10] sm:$0xff] }
 0x1ea   :  { %1638 = vmatpush.msrb.mxu3 %v1467_v35  ;;  %v1486_v35 = vperm.slane %v1484_v34, 0  ;;  %1753 = vmatpush.msra.mxu2 %v1740_v1 }
 0x1eb   :  { %1716 = vmatpush.msra.mxu1 %v1675_v12  ;;  %1697 = vmatpush.msra.mxu0 %v1658_v13  ;;  %v1771_v12 = vld [vmem:[%s2387_s9 + $0x8] sm:$0xff]  ;;  %v1770_v13 = vld [vmem:[%s2387_s9] sm:$0xff] }
 0x1ec   :  { %1639 = vmatpush.msrb.mxu3 %v1465_v36  ;;  %v1739_v36 = vld [vmem:[%s2385_s7 + $0x50] sm:$0xff] }
 0x1ed   :  { %1698 = vmatpush.msra.mxu0 %v1657_v14  ;;  %1717 = vmatpush.msra.mxu1 %v1674_v18  ;;  %v1848_v14 = vld [vmem:[#allocation14] ss:$0 sm:$0xff]  ;;  %v1849_v18 = vld [vmem:[#allocation16] ss:$0 sm:$0xff] }
 0x1ee   :  { %1640 = vmatpush.msrb.mxu3 %v1463_v31  ;;  %1754 = vmatpush.msra.mxu2 %v1739_v36 }
 0x1ef   :  { %1699 = vmatpush.msra.mxu0 %v1656_v15  ;;  %1718 = vmatpush.msra.mxu1 %v1673_v22 }
 0x1f0   :  { %1641 = vmatpush.msrb.mxu3 %v1461_v37  ;;  %v1738_v37 = vld [vmem:[%s2385_s7 + $0x48] sm:$0xff] }
 0x1f1   :  { %1700 = vmatpush.msra.mxu0 %v1655_v16  ;;  %1719 = vmatpush.msra.mxu1 %v1672_v32 }
 0x1f2   :  { %1642 = vmatpush.msrb.mxu3 %v1459_v38  ;;  %1755 = vmatpush.msra.mxu2 %v1738_v37 }
 0x1f3   :  { %1701 = vmatpush.msra.mxu0 %v1654_v17  ;;  %1720 = vmatpush.msra.mxu1 %v1671_v54 }
 0x1f4   :  { %1643 = vmatpush.msrb.mxu3 %v1457_v39  ;;  %v1737_v39 = vld [vmem:[%s2385_s7 + $0x40] sm:$0xff] }
 0x1f5   :  { %1702 = vmatpush.msra.mxu0 %v1653_v20  ;;  %1721 = vmatpush.msra.mxu1 %v1670_v59 }
 0x1f6   :  { %1644 = vmatpush.msrb.mxu3 %v1455_v40  ;;  %1756 = vmatpush.msra.mxu2 %v1737_v39 }
 0x1f7   :  { %1703 = vmatpush.msra.mxu0 %v1652_v23  ;;  %1722 = vmatpush.msra.mxu1 %v1669_v60 }
 0x1f8   :  { %1645 = vmatpush.msrb.mxu3 %v1453_v41  ;;  %v1736_v41 = vld [vmem:[%s2385_s7 + $0x38] sm:$0xff] }
 0x1f9   :  { %1723 = vmatpush.msra.mxu1 %v1668_v19  ;;  %1757 = vmatpush.msra.mxu2 %v1736_v41 }
 0x205   :  { %v1209_v43 = vpop.f32.mrf.mxu0 }
 0x206   :  { %v1210_v44 = vadd.f32 %v1209_v43, %v686_v42 }
 0x207   :  { %v1229_v28 = vpop.f32.mrf.mxu1 }
 0x208   :  { %v1230_v45 = vadd.f32 %v1229_v28, %v1210_v44  ;;  %v1487_v44 = vperm.slane %v1484_v34, 1 }
 0x20c   :  { %v1249_v25 = vpop.f32.mrf.mxu2  ;;  %v1269_v47 = vpop.f32.mrf.mxu3 }
 0x20d   :  { %v1250_v21 = vadd.f32 %v1249_v25, %v1230_v45 }
 0x20f   :  { %v1270_v48 = vadd.f32 %v1269_v47, %v1250_v21 }
 0x210   :  { %v1289_v49 = vpop.f32.mrf.mxu0 }
 0x211   :  { %v1290_v26 = vadd.f32 %v1289_v49, %v1270_v48  ;;  %v1309_v27 = vpop.f32.mrf.mxu1 }
 0x213   :  { %v1310_v9 = vadd.f32 %v1309_v27, %v1290_v26 }
 0x21c   :  { %v1329_v50 = vpop.f32.mrf.mxu2  ;;  %v1349_v52 = vpop.f32.mrf.mxu3 }
 0x21d   :  { %v1330_v51 = vadd.f32 %v1329_v50, %v1310_v9 }
 0x21f   :  { %v1350_v33 = vadd.f32 %v1349_v52, %v1330_v51 }
 0x221   :  { %v1355_v46 = vmax.f32 %v1350_v33, 0.0  ;;  %v1735_v33 = vld [vmem:[%s2385_s7 + $0x30] sm:$0xff] }
 0x222   :  { %1758 = vmatpush.msra.mxu2 %v1735_v33 }
 0x223   :  { %1566 = vmatmul.f32.vlgmr.msra.gmra.mxu3 %v1355_v46 }
 0x224   :  { %1794 = vmatpush.msra.mxu3 %v1777_v61 }
 0x226   :  { %1795 = vmatpush.msra.mxu3 %v1776_v53 }
 0x228   :  { %1796 = vmatpush.msra.mxu3 %v1775_v62 }
 0x22a   :  { %1797 = vmatpush.msra.mxu3 %v1774_v63 }
 0x22b   :  { %1646 = vmatmul.f32.vlgmr.msrb.gmra.mxu3 %v1355_v46  ;;  %v1734_v46 = vld [vmem:[%s2385_s7 + $0x28] sm:$0xff] }
 0x22c   :  { %1759 = vmatpush.msra.mxu2 %v1734_v46  ;;  %1798 = vmatpush.msra.mxu3 %v1773_v0 }
 0x22e   :  { %1760 = vmatpush.msra.mxu2 %v1733_v2  ;;  %1799 = vmatpush.msra.mxu3 %v1772_v11 }
 0x230   :  { %1761 = vmatpush.msra.mxu2 %v1732_v55  ;;  %1800 = vmatpush.msra.mxu3 %v1771_v12 }
 0x232   :  { %1762 = vmatpush.msra.mxu2 %v1731_v56  ;;  %1801 = vmatpush.msra.mxu3 %v1770_v13 }
 0x233   :  { %v1507_v31 = vpop.f32.mrf.mxu0 }
 0x234   :  { %v1508_v38 = vadd.f32 %v1507_v31, %v1486_v35  ;;  %v1527_v42 = vpop.f32.mrf.mxu1  ;;  %1763 = vmatpush.msra.mxu2 %v1730_v57 }
 0x236   :  { %v1528_v43 = vadd.f32 %v1527_v42, %v1508_v38  ;;  %1764 = vmatpush.msra.mxu2 %v1729_v58 }
 0x253   :  { %v1587_v28 = vpop.f32.mrf.mxu0 }
 0x254   :  { %v1588_v21 = vadd.f32 %v1587_v28, %v1487_v44  ;;  %v1607_v49 = vpop.f32.mrf.mxu1 }
 0x256   :  { %v1608_v27 = vadd.f32 %v1607_v49, %v1588_v21 }
 0x25b   :  { %v1547_v40 = vpop.f32.mrf.mxu2 }
 0x25c   :  { %v1548_v45 = vadd.f32 %v1547_v40, %v1528_v43 }
 0x263   :  { %v1627_v26 = vpop.f32.mrf.mxu2 }
 0x264   :  { %v1628_v9 = vadd.f32 %v1627_v26, %v1608_v27 }
 0x2a6   :  { %v1567_v25 = vpop.f32.mrf.mxu3 }
 0x2a7   :  { %v1568_v47 = vadd.f32 %v1567_v25, %v1548_v45 }
 0x2a9   :  { %v1650_v48 = vmax.f32 %v1568_v47, 0.0 }
 0x2ab   :  { %1704 = vmatmul.f32.vlgmr.msra.gmra.mxu0 %v1650_v48 }
 0x2ae   :  { %v1647_v50 = vpop.f32.mrf.mxu3 }
 0x2af   :  { %v1648_v51 = vadd.f32 %v1647_v50, %v1628_v9 }
 0x2b1   :  { %v1651_v52 = vmax.f32 %v1648_v51, 0.0 }
 0x2b3   :  { %1724 = vmatmul.f32.vlgmr.msra.gmra.mxu1 %v1651_v52 }
 0x328   :  { %v1705_v5 = vpop.f32.mrf.mxu0 }
 0x329   :  { %v1706_v6 = vadd.f32 %v1847_v4, %v1705_v5 }
 0x330   :  { %v1725_v7 = vpop.f32.mrf.mxu1 }
 0x331   :  { %v1726_v8 = vadd.f32 %v1725_v7, %v1706_v6 }
 0x333   :  { %v1728_v10 = vmax.f32 %v1726_v8, 0.0 }
 0x335   :  { %1765 = vmatmul.f32.vlgmr.msra.gmra.mxu2 %v1728_v10 }
 0x3b8   :  { %v1766_v15 = vpop.f32.mrf.mxu2 }
 0x3b9   :  { %v1767_v16 = vadd.f32 %v1848_v14, %v1766_v15 }
 0x3bb   :  { %v1769_v17 = vmax.f32 %v1767_v16, 0.0 }
 0x3bd   :  { %1830 = vmatmul.msk.f32.vlgmr.msra.gmra.mxu3 %vm1782_vm0, %v1769_v17 }
 0x440   :  { %v1803_v20 = vpop.f32.mrf.mxu3 }
 0x441   :  { %v1804_v22 = vadd.f32 %v1849_v18, %v1803_v20 }
 0x443   :  { %v1806_v23 = vmax.f32 %v1804_v22, 0.0 }
 0x445   :  { %1808 = vst.msk [vmem:[#allocation17] sm:$0x3] %vm1807_vm1, %v1806_v23 }
 0x446   :  { %1819 = dma.vmem_to_hbm [thread:$0]  %s1815_s2, 32, %s1817_s17, [#allocation4]  }
 0x447   :  { %2108 = dma.done.wait [#allocation4], 32  }
 0x448   :  { %2109 = vsyncadd [#allocation4], 4294967264 }
 0x449   :  { %1824 = vsyncpa [#allocation3], 1 }
 0x44a   :  { %1825 = vsyncpa [#allocation6], 1 }
 0x44b   :  { %1826 = vsyncpa [#allocation9], 1 }
 0x44c   :  { %1827 = vsyncpa [#allocation12], 1 }
 0x44d   :  { %1828 = vsyncpa [#allocation15], 1 }
 0x44e   :  { %1829 = vsyncpa [#allocation4], 1 }

</bundles_post_ra>
